<compile_context>
chip_gen: v7x
topology: tpu7x:2x2x1
jax: 0.10.0
libtpu: 0.0.40
codegen_flags: <defaults>
</compile_context>

<pallas_src>
import functools

import jax
import jax.numpy as jnp
from jax.experimental import pallas as pl
from jax.experimental.pallas import tpu as pltpu

BN_EPS = 1e-5
BN_SCALE = 1.0 / (1.0 + BN_EPS) ** 0.5   # eval-mode BN fold (gamma=1, beta=0, rm=0, rv=1)


def _round_up(x, m):
    return (x + m - 1) // m * m


def _pick_tk(kp):
    """K tile: whole K when small, else the largest 128-multiple that divides kp."""
    if kp <= 1024:
        return kp
    for t in (1024, 768, 640, 512, 384, 256, 128):
        if kp % t == 0:
            return t
    return 128


def _pick_tm(mp):
    """Row tile: largest divisor <= 512 (kept >=16 so bf16 sublane packing stays whole)."""
    for t in (512, 256, 128, 64, 32, 16):
        if mp > t and mp % t == 0:
            return t
    return mp


# -----------------------------------------------------------------------------
# Fused matmul (+ shift, + Mish) kernel: used for every im2col'd Conv / Linear
# -----------------------------------------------------------------------------
def _mm_kernel(x_ref, w_ref, b_ref, o_ref, acc_ref, *, tk, apply_mish):
    k = pl.program_id(2)

    @pl.when(k == 0)
    def _():
        acc_ref[...] = jnp.zeros_like(acc_ref)

    if tk == x_ref.shape[1]:          # single K step: no dynamic slice needed
        xk = x_ref[...]
    else:
        start = pl.multiple_of(k * tk, 128)
        xk = x_ref[:, pl.ds(start, tk)]
    acc_ref[...] += jnp.dot(xk, w_ref[...], preferred_element_type=jnp.float32)

    @pl.when(k == pl.num_programs(2) - 1)
    def _():
        y = acc_ref[...] + b_ref[...]
        if apply_mish:
            # mish(y) = y * tanh(softplus(y)), numerically stable softplus (EUP ops)
            sp = jnp.maximum(y, 0.0) + jnp.log(1.0 + jnp.exp(-jnp.abs(y)))
            y = y * jnp.tanh(sp)
        o_ref[...] = y


def matmul_affine(x, wp, bp, n_out, *, apply_mish):
    """x: [M, K] float, wp: [Kp, Np] bf16 (BN scale pre-folded), bp: [1, Np] f32.
    Returns [M, n_out] f32 = [mish](x @ w + b)."""
    M, K = x.shape
    Kp, Np = wp.shape
    Mp = _round_up(M, 8)
    xb = x.astype(jnp.bfloat16)
    if (Mp, Kp) != (M, K):
        xb = jnp.pad(xb, ((0, Mp - M), (0, Kp - K)))

    tm = _pick_tm(Mp)
    # keep the resident (tm, Kp) x tile comfortably inside VMEM
    while tm > 16 and tm * Kp * 2 > (8 << 20) and (tm // 2) % 16 == 0:
        tm //= 2
    tn = 256 if Np % 256 == 0 else 128          # match the 256-wide MXU on v6e/v7x
    if Mp // tm == 1 and Np // tn == 1 and Np >= 256:
        tn = 128                                 # expose >=2 parallel blocks (v7x megacore)
    tk = _pick_tk(Kp)

    out = pl.pallas_call(
        functools.partial(_mm_kernel, tk=tk, apply_mish=apply_mish),
        grid=(Mp // tm, Np // tn, Kp // tk),
        in_specs=[
            pl.BlockSpec((tm, Kp), lambda m, n, k: (m, 0)),   # resident across n, k
            pl.BlockSpec((tk, tn), lambda m, n, k: (k, n)),
            pl.BlockSpec((1, tn), lambda m, n, k: (0, n)),
        ],
        out_specs=pl.BlockSpec((tm, tn), lambda m, n, k: (m, n)),
        out_shape=jax.ShapeDtypeStruct((Mp, Np), jnp.float32),
        scratch_shapes=[pltpu.VMEM((tm, tn), jnp.float32)],
        compiler_params=pltpu.CompilerParams(
            dimension_semantics=("parallel", "parallel", "arbitrary")),
    )(xb, wp, bp)
    return out[:M, :n_out]


# -----------------------------------------------------------------------------
# Depthwise 7x7 conv + BN affine (whole-array)
# -----------------------------------------------------------------------------
def _dwconv_bn_kernel(x_ref, w_ref, s_ref, b_ref, o_ref):
    n, h, w, c = o_ref.shape
    acc = jnp.zeros((n, h, w, c), jnp.float32)
    for i in range(7):
        for j in range(7):
            acc = acc + x_ref[:, i:i + h, j:j + w, :] * w_ref[i, j]
    o_ref[...] = (acc * s_ref[0] + b_ref[0]).astype(o_ref.dtype)


def dwconv7_bn(x, w, scale, shift):
    """Depthwise 7x7, stride 1, pad 3, fused with the BN affine.  NHWC f32 -> bf16."""
    n, h, ww, c = x.shape
    xp = jnp.pad(x, ((0, 0), (3, 3), (3, 3), (0, 0)))
    return pl.pallas_call(
        _dwconv_bn_kernel,
        out_shape=jax.ShapeDtypeStruct((n, h, ww, c), jnp.bfloat16),
    )(xp, w, scale, shift)


# -----------------------------------------------------------------------------
# Fused ConvNeXt-block MLP: mish(yf @ w1 + b1) @ (w2*gamma) + b2*gamma + residual
# The 4C-wide intermediate stays in registers/VMEM; hidden dim streamed in chunks.
# -----------------------------------------------------------------------------
def _block_mlp_kernel(yf_ref, res_ref, w1_ref, b1_ref, w2_ref, b2_ref, o_ref):
    h = pl.program_id(1)

    @pl.when(h == 0)
    def _():
        o_ref[...] = res_ref[...] + b2_ref[...]

    y1 = jnp.dot(yf_ref[...], w1_ref[...], preferred_element_type=jnp.float32)
    y1 = y1 + b1_ref[...]
    sp = jnp.maximum(y1, 0.0) + jnp.log(1.0 + jnp.exp(-jnp.abs(y1)))
    y1 = y1 * jnp.tanh(sp)
    o_ref[...] += jnp.dot(y1.astype(jnp.bfloat16), w2_ref[...],
                          preferred_element_type=jnp.float32)


def block_mlp(yf, res, w1, b1, w2g, shift2):
    mp, c = yf.shape
    hdim = w1.shape[1]
    th = min(512, hdim)
    tm = mp // 2 if (mp > 16 and (mp // 2) % 16 == 0) else mp
    return pl.pallas_call(
        _block_mlp_kernel,
        grid=(mp // tm, hdim // th),
        in_specs=[
            pl.BlockSpec((tm, c), lambda m, h: (m, 0)),    # dwconv output (bf16)
            pl.BlockSpec((tm, c), lambda m, h: (m, 0)),    # residual (f32)
            pl.BlockSpec((c, th), lambda m, h: (0, h)),    # w1 (bf16)
            pl.BlockSpec((1, th), lambda m, h: (0, h)),    # b1
            pl.BlockSpec((th, c), lambda m, h: (h, 0)),    # w2 * gamma (bf16)
            pl.BlockSpec((1, c), lambda m, h: (0, 0)),     # b2 * gamma
        ],
        out_specs=pl.BlockSpec((tm, c), lambda m, h: (m, 0)),
        out_shape=jax.ShapeDtypeStruct((mp, c), jnp.float32),
        compiler_params=pltpu.CompilerParams(
            dimension_semantics=("parallel", "arbitrary")),
    )(yf, res, w1, b1, w2g, shift2)


# -----------------------------------------------------------------------------
# Fused SPP: identity + maxpool 5/9/13 (stride 1, same padding) -> 4C channels
# -----------------------------------------------------------------------------
def _spp_kernel(x_ref, o_ref, *, pools, pmax):
    n, h, w, c4 = o_ref.shape
    c = c4 // (len(pools) + 1)
    o_ref[:, :, :, 0:c] = x_ref[:, pmax:pmax + h, pmax:pmax + w, :]
    for idx, ksz in enumerate(pools):
        p = ksz // 2
        m = jnp.full((n, h, w, c), -jnp.inf, jnp.float32)
        for i in range(ksz):
            for j in range(ksz):
                m = jnp.maximum(
                    m, x_ref[:, pmax - p + i:pmax - p + i + h,
                             pmax - p + j:pmax - p + j + w, :])
        off = (idx + 1) * c
        o_ref[:, :, :, off:off + c] = m


def spp_concat(x, pools=(5, 9, 13)):
    n, h, w, c = x.shape
    pmax = max(pools) // 2
    xp = jnp.pad(x, ((0, 0), (pmax, pmax), (pmax, pmax), (0, 0)),
                 constant_values=-jnp.inf)
    return pl.pallas_call(
        functools.partial(_spp_kernel, pools=pools, pmax=pmax),
        out_shape=jax.ShapeDtypeStruct((n, h, w, c * (len(pools) + 1)), jnp.float32),
    )(xp)


# -----------------------------------------------------------------------------
# Glue: im2col (indexing only), module params and application
# -----------------------------------------------------------------------------
def _im2col(x, k, stride, pad):
    n, h, w, c = x.shape
    xp = jnp.pad(x, ((0, 0), (pad, pad), (pad, pad), (0, 0))) if pad else x
    ho = (h + 2 * pad - k) // stride + 1
    wo = (w + 2 * pad - k) // stride + 1
    cols = []
    for i in range(k):
        for j in range(k):
            cols.append(xp[:, i:i + (ho - 1) * stride + 1:stride,
                           j:j + (wo - 1) * stride + 1:stride, :])
    patches = jnp.concatenate(cols, axis=-1) if len(cols) > 1 else cols[0]
    return patches.reshape(n * ho * wo, k * k * c), (n, ho, wo)


def init_my_conv(key, cin, cout, k, stride=1, pad=0, bn_act=True, wstd=None):
    std = wstd if wstd is not None else (2.0 / (cin * k * k)) ** 0.5
    w = jax.random.normal(key, (k, k, cin, cout), jnp.float32) * std
    if bn_act:
        scale = jnp.full((cout,), BN_SCALE, jnp.float32)
        shift = jnp.zeros((cout,), jnp.float32)
    else:
        scale = jnp.ones((cout,), jnp.float32)
        shift = jnp.zeros((cout,), jnp.float32)      # conv bias (init zero)
    kdim = k * k * cin
    kp = _round_up(kdim, 128)
    np_ = _round_up(cout, 128)
    # Fold the BN/affine scale into the weight columns; pad + cast once at init.
    wmat = (w.reshape(kdim, cout) * scale[None, :]).astype(jnp.bfloat16)
    wmat = jnp.pad(wmat, ((0, kp - kdim), (0, np_ - cout)))
    shiftp = jnp.pad(shift, (0, np_ - cout)).reshape(1, np_)
    return {"type": "conv", "wmat": wmat, "shift": shiftp,
            "k": k, "stride": stride, "pad": pad, "mish": bn_act, "cout": cout}


def apply_my_conv(p, x):
    patches, (n, ho, wo) = _im2col(x.astype(jnp.bfloat16), p["k"], p["stride"], p["pad"])
    y = matmul_affine(patches, p["wmat"], p["shift"], p["cout"], apply_mish=p["mish"])
    return y.reshape(n, ho, wo, p["cout"])


def init_conv_block(key, dim, layer_scale_init_value=1e-6):
    k1, k2, k3 = jax.random.split(key, 3)
    dw_w = jax.random.normal(k1, (7, 7, dim), jnp.float32) * (2.0 / 49.0) ** 0.5
    dw_bias = jnp.zeros((dim,), jnp.float32)
    w1 = jax.random.normal(k2, (dim, 4 * dim), jnp.float32) * (2.0 / dim) ** 0.5
    b1 = jnp.zeros((1, 4 * dim), jnp.float32)
    w2 = jax.random.normal(k3, (4 * dim, dim), jnp.float32) * (2.0 / (4 * dim)) ** 0.5
    b2 = jnp.zeros((dim,), jnp.float32)
    gamma = jnp.full((dim,), layer_scale_init_value, jnp.float32)
    return {"type": "block", "dim": dim,
            "dw_w": dw_w,
            "dw_scale": jnp.full((1, dim), BN_SCALE, jnp.float32),
            "dw_shift": (dw_bias * BN_SCALE).reshape(1, dim),   # dw bias folded through BN
            "w1": w1.astype(jnp.bfloat16), "b1": b1,
            "w2g": (w2 * gamma[None, :]).astype(jnp.bfloat16),  # gamma folded into w2
            "shift2": (b2 * gamma).reshape(1, dim)}


def apply_conv_block(p, x):
    n, h, w, c = x.shape
    y = dwconv7_bn(x, p["dw_w"], p["dw_scale"], p["dw_shift"])      # bf16 NHWC
    m = n * h * w
    mp = _round_up(m, 8)
    yf = y.reshape(m, c)
    res = x.reshape(m, c)
    if mp > m:
        yf = jnp.pad(yf, ((0, mp - m), (0, 0)))
        res = jnp.pad(res, ((0, mp - m), (0, 0)))
    out = block_mlp(yf, res, p["w1"], p["b1"], p["w2g"], p["shift2"])
    return out[:m].reshape(n, h, w, c)


def apply_seq(ps, x):
    for p in ps:
        x = apply_my_conv(p, x) if p["type"] == "conv" else apply_conv_block(p, x)
    return x


def init_model(key, in_channels=3, num_classes=20):
    depths = [64, 128, 256, 512, 1024]
    num_repeats = [1, 2, 5, 5, 4]
    up = [512, 256, 128]
    keys = iter(jax.random.split(key, 512))
    nk = lambda: next(keys)

    def res_block(channels, reps):
        return [init_conv_block(nk(), channels) for _ in range(reps)]

    params = {"num_classes": num_classes, "num_repeats": num_repeats}
    params["downsample"] = [[init_my_conv(nk(), in_channels, 32, 3, 1, 1),
                             init_my_conv(nk(), 32, 64, 3, 2, 1)]]
    for i in range(4):
        params["downsample"].append([init_my_conv(nk(), depths[i], depths[i + 1], 3, 2, 1)])
    params["stages"] = [res_block(depths[i], num_repeats[i]) for i in range(5)]

    def scale_head(cin):
        return [init_my_conv(nk(), cin, 2 * cin, 3, 1, 1),
                init_my_conv(nk(), 2 * cin, (num_classes + 5) * 3, 1, 1, 0, bn_act=False)]

    params["scales"] = [scale_head(512), scale_head(256), scale_head(128)]
    params["routes"] = [
        [init_my_conv(nk(), 1024, 1024, 3, 1, 1)] + res_block(1024, 1)
        + [init_my_conv(nk(), 1024, 512, 1, 1, 0)],
        [init_my_conv(nk(), 768, 256, 1, 1, 0),
         init_my_conv(nk(), 256, 512, 3, 1, 1)] + res_block(512, 1)
        + [init_my_conv(nk(), 512, 256, 1, 1, 0)],
        [init_my_conv(nk(), 384, 128, 1, 1, 0),
         init_my_conv(nk(), 128, 256, 3, 1, 1)] + res_block(256, 1)
        + [init_my_conv(nk(), 256, 128, 1, 1, 0)],
    ]
    params["upsample"] = [init_my_conv(nk(), up[i], up[i + 1], 1, 1, 0) for i in range(2)]
    params["spp_head"] = init_my_conv(nk(), 1024, 512, 1, 1, 0, wstd=0.01)
    params["downstream"] = init_my_conv(nk(), 2048, 1024, 3, 1, 1)
    return params


def forward(params, x_nchw):
    num_classes = params["num_classes"]
    x = jnp.transpose(x_nchw, (0, 2, 3, 1)).astype(jnp.float32)   # NCHW -> NHWC
    routes = []
    # ---------------- BACKBONE ----------------
    for i in range(5):
        x = apply_seq(params["downsample"][i], x)
        x = apply_seq(params["stages"][i], x)
        if params["num_repeats"][i] == 5:
            routes.append(x)
    # ---------------- NECK (SPP + downstream conv) ----------------
    x = apply_my_conv(params["spp_head"], x)
    x = spp_concat(x, (5, 9, 13))
    x = apply_my_conv(params["downstream"], x)

    # ---------------- HEAD ----------------
    def scale_out(head, xi):
        y = apply_seq(head, xi)                          # [N, H, W, 3*(nc+5)] (NHWC)
        n, h, w, _ = y.shape
        y = y.reshape(n, h, w, 3, num_classes + 5)
        return jnp.transpose(y, (0, 3, 1, 2, 4))         # [N, 3, H, W, nc+5]

    outs = []
    for i in range(2):
        x = apply_seq(params["routes"][i], x)
        outs.append(scale_out(params["scales"][i], x))
        x = apply_my_conv(params["upsample"][i], x)
        x = jnp.repeat(jnp.repeat(x, 2, axis=1), 2, axis=2)   # nearest 2x upsample
        x = jnp.concatenate([x, routes[-i - 1]], axis=-1)
    x = apply_seq(params["routes"][-1], x)
    outs.append(scale_out(params["scales"][-1], x))
    return outs


if __name__ == "__main__":
    key = jax.random.PRNGKey(0)
    kp, kx = jax.random.split(key)
    params = init_model(kp, in_channels=3, num_classes=20)
    # Smallest spatial size consistent with the 32x total downsampling.
    x = jax.random.normal(kx, (1, 3, 32, 32), jnp.float32)   # NCHW reference input
    outs = jax.block_until_ready(forward(params, x))
    expected = [(1, 3, 1, 1, 25), (1, 3, 2, 2, 25), (1, 3, 4, 4, 25)]
    assert [tuple(o.shape) for o in outs] == expected, [o.shape for o in outs]
    print("KERNEL_OK")
</pallas_src>

<mosaic_0001>
module attributes {stable_mosaic.version = 11 : i64} {
  func.func @_mm_kernel(%arg0: i32, %arg1: i32, %arg2: i32, %arg3: memref<512x128xbf16, #tpu.memory_space<vmem>>, %arg4: memref<128x128xbf16, #tpu.memory_space<vmem>>, %arg5: memref<1x128xf32, #tpu.memory_space<vmem>>, %arg6: memref<512x128xf32, #tpu.memory_space<vmem>>, %arg7: memref<512x128xf32, #tpu.memory_space<vmem>>) attributes {dimension_semantics = [#tpu.dimension_semantics<parallel>, #tpu.dimension_semantics<parallel>, #tpu.dimension_semantics<arbitrary>], iteration_bounds = array<i64: 2, 1, 1>, scalar_prefetch = 0 : i64, scratch_operands = 1 : i64, tpu.core_type = #tpu.core_type<tc>, window_params = [{transform_indices = @transform_0, window_bounds = array<i64: 512, 128>}, {transform_indices = @transform_1, window_bounds = array<i64: 128, 128>}, {transform_indices = @transform_2, window_bounds = array<i64: 1, 128>}, {transform_indices = @transform_3, window_bounds = array<i64: 512, 128>}]} {
    %c0_i32 = arith.constant 0 : i32
    %0 = arith.cmpi eq, %arg2, %c0_i32 : i32
    %1 = arith.extui %0 : i1 to i32
    %c0_i32_0 = arith.constant 0 : i32
    %2 = arith.cmpi ne, %1, %c0_i32_0 : i32
    scf.if %2 {
      %cst_10 = arith.constant 0.000000e+00 : f32
      %12 = vector.broadcast %cst_10 : f32 to vector<512x128xf32>
      %c0_11 = arith.constant 0 : index
      %c0_12 = arith.constant 0 : index
      %13 = vector.load %arg7[%c0_11, %c0_12] : memref<512x128xf32, #tpu.memory_space<vmem>>, vector<512x128xf32>
      tpu.vector_store %arg7[%c0_11, %c0_12], %12 {strides = array<i32>} : memref<512x128xf32, #tpu.memory_space<vmem>>, vector<512x128xf32>,
    } else {
    }
    %c0 = arith.constant 0 : index
    %c0_1 = arith.constant 0 : index
    %3 = vector.load %arg3[%c0, %c0_1] : memref<512x128xbf16, #tpu.memory_space<vmem>>, vector<512x128xbf16>
    %c0_2 = arith.constant 0 : index
    %c0_3 = arith.constant 0 : index
    %4 = vector.load %arg7[%c0_2, %c0_3] : memref<512x128xf32, #tpu.memory_space<vmem>>, vector<512x128xf32>
    %c0_4 = arith.constant 0 : index
    %c0_5 = arith.constant 0 : index
    %5 = vector.load %arg4[%c0_4, %c0_5] : memref<128x128xbf16, #tpu.memory_space<vmem>>, vector<128x128xbf16>
    %cst = arith.constant dense<0.000000e+00> : vector<512x128xf32>
    %6 = tpu.matmul %3, %5, %cst {dimension_numbers = #tpu.dot_dimension_numbers<[1], [0], [0], [1], [0, 0, 1, 1], [], []>} : vector<512x128xbf16>, vector<128x128xbf16>, vector<512x128xf32> -> vector<512x128xf32>
    %7 = arith.addf %4, %6 : vector<512x128xf32>
    %c0_6 = arith.constant 0 : index
    %c0_7 = arith.constant 0 : index
    %8 = vector.load %arg7[%c0_6, %c0_7] : memref<512x128xf32, #tpu.memory_space<vmem>>, vector<512x128xf32>
    tpu.vector_store %arg7[%c0_6, %c0_7], %7 {strides = array<i32>} : memref<512x128xf32, #tpu.memory_space<vmem>>, vector<512x128xf32>,
    %c0_i32_8 = arith.constant 0 : i32
    %9 = arith.cmpi eq, %arg2, %c0_i32_8 : i32
    %10 = arith.extui %9 : i1 to i32
    %c0_i32_9 = arith.constant 0 : i32
    %11 = arith.cmpi ne, %10, %c0_i32_9 : i32
    scf.if %11 {
      %c0_10 = arith.constant 0 : index
      %c0_11 = arith.constant 0 : index
      %12 = vector.load %arg7[%c0_10, %c0_11] : memref<512x128xf32, #tpu.memory_space<vmem>>, vector<512x128xf32>
      %c0_12 = arith.constant 0 : index
      %c0_13 = arith.constant 0 : index
      %13 = vector.load %arg5[%c0_12, %c0_13] : memref<1x128xf32, #tpu.memory_space<vmem>>, vector<1x128xf32>
      %14 = vector.broadcast %13 : vector<1x128xf32> to vector<512x128xf32>
      %15 = arith.addf %12, %14 : vector<512x128xf32>
      %cst_14 = arith.constant 0.000000e+00 : f32
      %16 = vector.broadcast %cst_14 : f32 to vector<512x128xf32>
      %17 = arith.maximumf %15, %16 : vector<512x128xf32>
      %18 = math.absf %15 : vector<512x128xf32>
      %cst_15 = arith.constant 0.000000e+00 : f32
      %19 = vector.broadcast %cst_15 : f32 to vector<512x128xf32>
      %20 = arith.subf %19, %18 : vector<512x128xf32>
      %21 = math.exp %20 : vector<512x128xf32>
      %cst_16 = arith.constant 1.000000e+00 : f32
      %22 = vector.broadcast %cst_16 : f32 to vector<512x128xf32>
      %23 = arith.addf %22, %21 : vector<512x128xf32>
      %24 = math.log %23 : vector<512x128xf32>
      %25 = arith.addf %17, %24 : vector<512x128xf32>
      %26 = math.tanh %25 : vector<512x128xf32>
      %27 = arith.mulf %15, %26 : vector<512x128xf32>
      %c0_17 = arith.constant 0 : index
      %c0_18 = arith.constant 0 : index
      %28 = vector.load %arg6[%c0_17, %c0_18] : memref<512x128xf32, #tpu.memory_space<vmem>>, vector<512x128xf32>
      tpu.vector_store %arg6[%c0_17, %c0_18], %27 {strides = array<i32>} : memref<512x128xf32, #tpu.memory_space<vmem>>, vector<512x128xf32>,
    } else {
    }
    return
  }
  func.func @transform_0(%arg0: i32, %arg1: i32, %arg2: i32) -> (i32, i32) {
    %c0_i32 = arith.constant 0 : i32
    %c0_i32_0 = arith.constant 0 : i32
    return %arg0, %c0_i32 : i32, i32
  }
  func.func @transform_1(%arg0: i32, %arg1: i32, %arg2: i32) -> (i32, i32) {
    %c0_i32 = arith.constant 0 : i32
    return %arg2, %arg1 : i32, i32
  }
  func.func @transform_2(%arg0: i32, %arg1: i32, %arg2: i32) -> (i32, i32) {
    %c0_i32 = arith.constant 0 : i32
    %c0_i32_0 = arith.constant 0 : i32
    return %c0_i32, %arg1 : i32, i32
  }
  func.func @transform_3(%arg0: i32, %arg1: i32, %arg2: i32) -> (i32, i32) {
    %c0_i32 = arith.constant 0 : i32
    return %arg0, %arg1 : i32, i32
  }
}

</mosaic_0001>

<bundles_post_ra>
// kernel: tpu_custom_call.1
= control target key start
LH: loop header
LB: loop body
LE: loop exit
PB: predicated region body
PF: predicated region fallthrough
CT: control target
= control target key end

     0   :  { %8 = vsyncpa [#allocation4], 0  ;;  %s3974_s0 = inlined_call_operand.hbm [shape: bf16[1024,128], index: 0, kind: input, shape index: {}]   ;;  %s3975_s1 = inlined_call_operand.hbm [shape: bf16[128,128], index: 1, kind: input, shape index: {}]   ;;  %s3976_s2 = inlined_call_operand.vmem [shape: f32[1,128], index: 2, kind: input, shape index: {}]   ;;  %s3977_s3 = inlined_call_operand.hbm [shape: f32[1024,128], index: 3, kind: output, shape index: {}]  }
   0x1   :  { %10 = vsyncpa [#allocation4 + $0x1], 0 }
   0x2   :  { %11 = vsyncpa [#allocation7], 0 }
   0x3   :  { %12 = vsyncpa [#allocation5], 0 }
   0x4   :  { %14 = vsyncpa [#allocation5 + $0x1], 0  ;;  %s3028_s12 = smov 0   ;;  %s3030_s13 = smov 0  }
   0x5   :  { %s3032_s14 = smov 0   ;;  %s3034_s15 = smov 0  }
   0x6   :  { %s3036_s16 = smov 0   ;;  %s3038_s17 = smov 0  }
   0x7 LB: > { %s2156_s18 = sadd.s32 4294967295, %s2999_s17   ;;  %s2157_s19 = sadd.s32 4294967294, %s2999_s17   ;;  %s2999_s17 = sphi %s3038_s17, %s20_s17   ;;  %s2995_s16 = sphi %s3036_s16, %s4037_s16   ;;  %s2991_s15 = sphi %s3034_s15, %s4036_s15   ;;  %s2987_s14 = sphi %s3032_s14, %s4035_s14   ;;  %s2983_s13 = sphi %s3030_s13, %s4034_s13   ;;  %s2979_s12 = sphi %s3028_s12, %s4033_s12  }
   0x8   : > { %p59_p0 = scmp.ne.s32.totalorder %s2983_s13, %s2979_s12  ;;  %p3062_p1 = scmp.eq.s32.totalorder %s2156_s18, 0 }
   0x9   : > { %p3066_p2 = scmp.eq.s32.totalorder %s2156_s18, 1  ;;  %p145_p3 = scmp.eq.s32.totalorder %s2157_s19, 1 }
   0xa   : > { %s3982_s20 = scalar_select %p3062_p1, 1, 0 }
   0xb   : > { %s3983_s21 = scalar_select %p3066_p2, 1, 0 }
   0xc   : > { %p3072_p4 = por %p3062_p1, %p59_p0  ;;  %p2158_p5 = scmp.ge.s32.totalorder %s2999_s17, 1 }
   0xd   : > { %p3077_p6 = por %p145_p3, %p59_p0  ;;  %p152_p7 = scmp.lt.s32.totalorder %s2999_s17, 3 }
   0xe   : > { %s3984_s22 = scalar_select %p3072_p4, 1, 0 }
   0xf   : > { %s3985_s23 = scalar_select %p3077_p6, 1, 0 }
  0x10   : > { %p3082_p8 = pnand %p2158_p5, %p152_p7  ;;  %s3001_s25 = smov [#allocation6]  }
  0x11   : > { %s168_s26 = sshll.u32 %s3001_s25, 4  ;;  %s39_s28 = sadd.s32 1, %s2995_s16  ;;  %s169_s26 = int_to_ptr.vmem [resolvable:$true] %s168_s26 }
  0x12   : > { %s3986_s24 = scalar_select %p3082_p8, 1, 0 }
  0x13   : > { %p2361_p9 = pneg %p3082_p8  ;;  %s2855_s4 = scalar_lea.hbm %s3975_s1, 1024 }
  0x14   : > { %p2856_p12 = scmp.ne.s32.totalorder %s3975_s1, %s2855_s4  ;;  %p2862_p5 = scmp.lt.u32.totalorder %s2855_s4, %s3975_s1 }
  0x15   : > { %p3091_p11 = pnand %p2361_p9, %p3062_p1 }
  0x17   : > { %p2857_p13 = pneg %p3091_p11 }
  0x19   : > { %p2858_p0 = pnand %p2857_p13, %p2856_p12 }
  0x1b   : > { %p2859_p3 = pneg %p2858_p0 }
  0x1d   : > { %p2864_p7 = pnand %p2862_p5, %p2859_p3 }
  0x1f   : > { %2867 = shalt.err (!%p2864_p7)
}
  0x20   : > { %s2868_s9 = scalar_lea.vmem %s169_s26, 1024  ;;  %p2876_p1 = scmp.lt.s32.totalorder %s169_s26, %s169_s26 }
  0x21   : > { %p2869_p9 = scmp.ne.s32.totalorder %s169_s26, %s2868_s9  ;;  %p2877_p4 = scmp.lt.s32.totalorder %s2868_s9, %s2868_s9 }
  0x23   : > { %p2871_p10 = pnand %p2869_p9, %p2857_p13  ;;  %p2878_p8 = por %p2877_p4, %p2876_p1 }
  0x25   : > { %p2872_p6 = pneg %p2871_p10 }
  0x27   : > { %p2879_p2 = pnand %p2878_p8, %p2872_p6 }
  0x29   : > { %2882 = shalt.err (!%p2879_p2)
}
  0x2a   : > { %s3002_s10 = smov 64   ;;  %s3003_s11 = smov 4  }
  0x2b   : > { %2364 = dma.hbm_to_vmem [thread:$0]  (!%p3091_p11), %s3975_s1, 1024, %s169_s26, [#allocation7], %s3002_s10, %s3002_s10, %s3003_s11  }
  0x2c   : > { %p41_p1 = scmp.ge.s32.totalorder %s39_s28, 2  ;;  %s46_s25 = sadd.s32 1, %s2987_s14 }
  0x2d   : > { %p53_p2 = scmp.ne.s32.totalorder %s2987_s14, %s2983_s13  ;;  %p54_p4 = scmp.eq.s32.totalorder %s2999_s17, 0 }
  0x2e   : > { %s4039_s28 = smov (%p41_p1, %s39_s28), 0  ;;  %p3989_p8 = scmp.ne.s32.totalorder %s3983_s21, 0 }
  0x2f   : > { %p3121_p6 = por %p54_p4, %p53_p2  ;;  %s43_s30 = ssub.s32 %s2995_s16, %s4039_s28 }
  0x30   : > { %p3127_p10 = por %p3989_p8, %p53_p2  ;;  %p2374_p12 = scmp.lt.s32.totalorder %s2999_s17, 2 }
  0x31   : > { %p44_p11 = scmp.eq.s32.totalorder %s43_s30, 0  ;;  %s188_s26 = sand.u32 1, %s2987_s14  }
  0x32   : > { %s2162_s4 = sshll.u32 %s188_s26, 8  ;;  %s2215_s6 = sshll.u32 %s2995_s16, 12 }
  0x33   : > { %s3136_s5 = scalar_select %p44_p11, %s2987_s14, %s46_s25  }
  0x34   : > { %s3142_s9 = scalar_lea.hbm %s3974_s0, %s2215_s6  ;;  %s192_s21 = scalar_lea.vmem [#allocation3], %s2162_s4 }
  0x35   : > { %s199_s18 = sshll.u32 %s192_s21, 4  ;;  %p3148_p13 = pnand %p2374_p12, %p3121_p6  ;;  %s3144_s18 = int_to_ptr.vmem [resolvable:$true] %s199_s18 }
  0x36   : > { %s3152_s25 = scalar_lea.sflag [#allocation4], %s188_s26  ;;  %s2883_s30 = scalar_lea.hbm %s3142_s9, 4096 }
  0x37   : > { %p2884_p0 = scmp.ne.s32.totalorder %s3142_s9, %s2883_s30  ;;  %p2885_p3 = pneg %p3148_p13 }
  0x38   : > { %s2888_s29 = scalar_lea.hbm %s3974_s0, 8192  ;;  %p2889_p9 = scmp.lt.u32.totalorder %s3142_s9, %s3974_s0 }
  0x39   : > { %p2886_p5 = pnand %p2885_p3, %p2884_p0  ;;  %p2890_p1 = scmp.lt.u32.totalorder %s2888_s29, %s2883_s30 }
  0x3a   : > { %p2892_p4 = scmp.lt.u32.totalorder %s2883_s30, %s3142_s9 }
  0x3b   : > { %p2887_p7 = pneg %p2886_p5  ;;  %p2891_p2 = por %p2890_p1, %p2889_p9 }
  0x3d   : > { %p2893_p6 = por %p2892_p4, %p2891_p2 }
  0x3f   : > { %p2894_p8 = pnand %p2893_p6, %p2887_p7 }
  0x41   : > { %2897 = shalt.err (!%p2894_p8)
}
  0x42   : > { %s2898_s26 = scalar_lea.vmem %s3144_s18, 4096  ;;  %s3004_s21 = smov [#allocation3]  }
  0x43   : > { %p2899_p12 = scmp.ne.s32.totalorder %s3144_s18, %s2898_s26  ;;  %s2903_s4 = sshll.u32 %s3004_s21, 4  ;;  %s2904_s4 = int_to_ptr.vmem [resolvable:$false] %s2903_s4 }
  0x44   : > { %s2905_s6 = scalar_lea.vmem %s2904_s4, 8192  ;;  %p2906_p5 = scmp.lt.s32.totalorder %s3144_s18, %s2904_s4 }
  0x45   : > { %p2901_p11 = pnand %p2899_p12, %p2885_p3  ;;  %p2907_p9 = scmp.lt.s32.totalorder %s2905_s6, %s2898_s26 }
  0x47   : > { %p2902_p0 = pneg %p2901_p11  ;;  %p2908_p1 = por %p2907_p9, %p2906_p5 }
  0x49   : > { %p2909_p2 = pnand %p2908_p1, %p2902_p0 }
  0x4b   : > { %2912 = shalt.err (!%p2909_p2)
}
  0x4c   : > { %2368 = dma.hbm_to_vmem [thread:$0]  (!%p3148_p13), %s3142_s9, 4096, %s3144_s18, %s3152_s25, %s3002_s10, %s3002_s10, %s3003_s11  }
  0x4d   : > { %p3992_p3 = scmp.ne.s32.totalorder %s3986_s24, 0 }
  0x4f   : > { %211 = sbr.rel (%p3992_p3) target bundleno = 589 (0x24d), region = 32 }
  0x56   : > { %s3186_s30 = sand.u32 1, %s2983_s13   ;;  %p3993_p7 = scmp.ne.s32.totalorder %s3984_s22, 0 }
  0x57   : > { %s2166_s29 = sshll.u32 %s3186_s30, 8  ;;  %s214_s7 = scalar_lea.sflag [#allocation4], %s3186_s30 }
  0x58   : > { %s3190_s8 = scalar_lea.vmem [#allocation3], %s2166_s29 }
  0x59   : > { %2966 = dma.done.wait (%p3993_p7), %s214_s7, 4096  }
  0x5a   : > { %2968 = vsyncadd (%p3993_p7), %s214_s7, 4294963200  ;;  %p3994_p13 = scmp.ne.s32.totalorder %s3982_s20, 0 }
  0x5c   : > { %2970 = dma.done.wait (%p3994_p13), [#allocation7], 1024  }
  0x5d   : > { %2972 = vsyncadd (%p3994_p13), [#allocation7], 4294966272  ;;  %v2430_v0 = vld [vmem:[#allocation6] sm:$0xff]   ;;  %v2431_v1 = vld [vmem:[#allocation6 + $0x8] sm:$0xff]   ;;  %s2168_s24 = sshll.u32 %s3186_s30, 9  ;;  %s2216_s18 = sshll.u32 %s2991_s15, 13 }
  0x5e   : > { %2257 = vmatprep.subr.bf16.mxu0 %v2430_v0  ;;  %2337 = vmatprep.subr.bf16.mxu1 %v2430_v0  ;;  %v2432_v2 = vld [vmem:[#allocation6 + $0x10] sm:$0xff]   ;;  %v2433_v3 = vld [vmem:[#allocation6 + $0x18] sm:$0xff]   ;;  %v2438_v4 = vld [vmem:[%s3190_s8] sm:$0xff]   ;;  %s3459_s10 = scalar_lea.vmem [#allocation8], %s2168_s24  ;;  %s3919_s21 = scalar_lea.hbm %s3977_s3, %s2216_s18 }
  0x5f   : > { %2258 = vmatpush3.bf16.msra.mxu0 %v2430_v0  ;;  %2345 = vmatpush3.bf16.msra.mxu1 %v2430_v0  ;;  %v2439_v5 = vld [vmem:[%s3190_s8 + $0x80] sm:$0xff]   ;;  %v2435_v7 = vld [vmem:[#allocation6 + $0x28] sm:$0xff]   ;;  %v2436_v8 = vld [vmem:[#allocation6 + $0x30] sm:$0xff]   ;;  %s2044_s19 = sshll.u32 %s3459_s10, 4  ;;  %s2030_s15 = scalar_lea.sflag [#allocation5], %s3186_s30  ;;  %s3923_s19 = int_to_ptr.vmem [resolvable:$true] %s2044_s19 }
  0x60   : > { %2259 = vmatprep.subr.bf16.mxu0 %v2431_v1  ;;  %2338 = vmatprep.subr.bf16.mxu1 %v2431_v1  ;;  %v2434_v6 = vld [vmem:[#allocation6 + $0x20] sm:$0xff]   ;;  %v2437_v9 = vld [vmem:[#allocation6 + $0x38] sm:$0xff]   ;;  %v2440_v10 = vld [vmem:[%s3190_s8 + $0x8] sm:$0xff]   ;;  %s2913_s4 = scalar_lea.vmem %s3923_s19, 8192  ;;  %s3005_s6 = smov [#allocation8]  }
  0x61   : > { %2273 = vmatprep.mubr.bf16.mxu0 %v2438_v4  ;;  %2305 = vmatprep.mubr.bf16.mxu1 %v2439_v5  ;;  %v2441_v11 = vld [vmem:[%s3190_s8 + $0x88] sm:$0xff]   ;;  %v2442_v12 = vld [vmem:[%s3190_s8 + $0x10] sm:$0xff]   ;;  %v2444_v14 = vld [vmem:[%s3190_s8 + $0x18] sm:$0xff]   ;;  %p2914_p4 = scmp.ne.s32.totalorder %s3923_s19, %s2913_s4  ;;  %s2917_s29 = sshll.u32 %s3005_s6, 4  ;;  %s2918_s29 = int_to_ptr.vmem [resolvable:$false] %s2917_s29 }
  0x62   : > { %v2443_v13 = vld [vmem:[%s3190_s8 + $0x90] sm:$0xff]   ;;  %v2445_v15 = vld [vmem:[%s3190_s8 + $0x98] sm:$0xff]   ;;  %v2446_v16 = vld [vmem:[%s3190_s8 + $0x20] sm:$0xff]   ;;  %s2919_s7 = scalar_lea.vmem %s2918_s29, 16384  ;;  %p2920_p12 = scmp.lt.s32.totalorder %s3923_s19, %s2918_s29 }
  0x63   : > { %2260 = vmatpush3.bf16.msra.mxu0 %v2431_v1  ;;  %2346 = vmatpush3.bf16.msra.mxu1 %v2431_v1  ;;  %v2447_v17 = vld [vmem:[%s3190_s8 + $0xa0] sm:$0xff]   ;;  %v2448_v18 = vld [vmem:[%s3190_s8 + $0x28] sm:$0xff]   ;;  %v2450_v20 = vld [vmem:[%s3190_s8 + $0x30] sm:$0xff]   ;;  %p2915_p6 = pnand %p2914_p4, %p3127_p10  ;;  %p2921_p11 = scmp.lt.s32.totalorder %s2919_s7, %s2913_s4 }
  0x64   : > { %2261 = vmatprep.subr.bf16.mxu0 %v2432_v2  ;;  %2339 = vmatprep.subr.bf16.mxu1 %v2432_v2  ;;  %v2449_v19 = vld [vmem:[%s3190_s8 + $0xa8] sm:$0xff]   ;;  %v2451_v21 = vld [vmem:[%s3190_s8 + $0xb0] sm:$0xff]   ;;  %v2452_v22 = vld [vmem:[%s3190_s8 + $0x38] sm:$0xff]  }
  0x65   : > { %v2453_v23 = vld [vmem:[%s3190_s8 + $0xb8] sm:$0xff]   ;;  %v2454_v24 = vld [vmem:[%s3190_s8 + $0x40] sm:$0xff]   ;;  %v2456_v26 = vld [vmem:[%s3190_s8 + $0x48] sm:$0xff]   ;;  %p2916_p8 = pneg %p2915_p6  ;;  %p2922_p0 = por %p2921_p11, %p2920_p12 }
  0x66   : > { %v2455_v25 = vld [vmem:[%s3190_s8 + $0xc0] sm:$0xff]   ;;  %v2457_v27 = vld [vmem:[%s3190_s8 + $0xc8] sm:$0xff]   ;;  %v2458_v28 = vld [vmem:[%s3190_s8 + $0x50] sm:$0xff]  }
  0x67   : > { %2262 = vmatpush3.bf16.msra.mxu0 %v2432_v2  ;;  %2347 = vmatpush3.bf16.msra.mxu1 %v2432_v2  ;;  %v2459_v29 = vld [vmem:[%s3190_s8 + $0xd0] sm:$0xff]   ;;  %v2460_v30 = vld [vmem:[%s3190_s8 + $0x58] sm:$0xff]   ;;  %v2462_v32 = vld [vmem:[%s3190_s8 + $0x60] sm:$0xff]   ;;  %p2923_p5 = pnand %p2922_p0, %p2916_p8 }
  0x68   : > { %2263 = vmatprep.subr.bf16.mxu0 %v2433_v3  ;;  %2340 = vmatprep.subr.bf16.mxu1 %v2433_v3  ;;  %v2461_v31 = vld [vmem:[%s3190_s8 + $0xd8] sm:$0xff]   ;;  %v2463_v33 = vld [vmem:[%s3190_s8 + $0xe0] sm:$0xff]   ;;  %v2464_v34 = vld [vmem:[%s3190_s8 + $0x68] sm:$0xff]  }
  0x69   : > { %v2465_v35 = vld [vmem:[%s3190_s8 + $0xe8] sm:$0xff]   ;;  %v2466_v36 = vld [vmem:[%s3190_s8 + $0x70] sm:$0xff]   ;;  %v2468_v38 = vld [vmem:[%s3190_s8 + $0x78] sm:$0xff]  }
  0x6a   : > { %v2467_v37 = vld [vmem:[%s3190_s8 + $0xf0] sm:$0xff]   ;;  %v2469_v39 = vld [vmem:[%s3190_s8 + $0xf8] sm:$0xff]   ;;  %v3235_v40 = vld [vmem:[%s3976_s2] ss:$0 sm:$0xff] }
  0x6b   : > { %2264 = vmatpush3.bf16.msra.mxu0 %v2433_v3  ;;  %2348 = vmatpush3.bf16.msra.mxu1 %v2433_v3 }
  0x6c   : > { %2265 = vmatprep.subr.bf16.mxu0 %v2434_v6  ;;  %2341 = vmatprep.subr.bf16.mxu1 %v2434_v6 }
  0x6f   : > { %2266 = vmatpush3.bf16.msra.mxu0 %v2434_v6  ;;  %2349 = vmatpush3.bf16.msra.mxu1 %v2434_v6 }
  0x70   : > { %2267 = vmatprep.subr.bf16.mxu0 %v2435_v7  ;;  %2342 = vmatprep.subr.bf16.mxu1 %v2435_v7 }
  0x73   : > { %2268 = vmatpush3.bf16.msra.mxu0 %v2435_v7  ;;  %2350 = vmatpush3.bf16.msra.mxu1 %v2435_v7 }
  0x74   : > { %2269 = vmatprep.subr.bf16.mxu0 %v2436_v8  ;;  %2343 = vmatprep.subr.bf16.mxu1 %v2436_v8 }
  0x77   : > { %2270 = vmatpush3.bf16.msra.mxu0 %v2436_v8  ;;  %2351 = vmatpush3.bf16.msra.mxu1 %v2436_v8 }
  0x78   : > { %2271 = vmatprep.subr.bf16.mxu0 %v2437_v9  ;;  %2344 = vmatprep.subr.bf16.mxu1 %v2437_v9 }
  0x7b   : > { %2272 = vmatpush3.bf16.msra.mxu0 %v2437_v9  ;;  %2352 = vmatpush3.bf16.msra.mxu1 %v2437_v9 }
  0x7e   : > { %2274 = vmatmul.mubr.bf16.vlgmr.msra.gmra.mrb[0].mxu0 %v2440_v10  ;;  %2306 = vmatmul.mubr.bf16.vlgmr.msra.gmra.mrb[0].mxu1 %v2441_v11 }
  0x7f   : > { %2277 = vmatprep.mubr.bf16.mxu0 %v2442_v12  ;;  %2309 = vmatprep.mubr.bf16.mxu1 %v2443_v13 }
  0x86   : > { %2278 = vmatmul.mubr.bf16.gmra.mrb[4].mxu0 %v2444_v14  ;;  %2310 = vmatmul.mubr.bf16.gmra.mrb[4].mxu1 %v2445_v15 }
  0x87   : > { %2281 = vmatprep.mubr.bf16.mxu0 %v2446_v16  ;;  %2313 = vmatprep.mubr.bf16.mxu1 %v2447_v17 }
  0x8e   : > { %2282 = vmatmul.mubr.bf16.gmra.mrb[8].mxu0 %v2448_v18  ;;  %2314 = vmatmul.mubr.bf16.gmra.mrb[8].mxu1 %v2449_v19 }
  0x8f   : > { %2285 = vmatprep.mubr.bf16.mxu0 %v2450_v20  ;;  %2317 = vmatprep.mubr.bf16.mxu1 %v2451_v21 }
  0x96   : > { %2286 = vmatmul.mubr.bf16.gmra.mrb[12].mxu0 %v2452_v22  ;;  %2318 = vmatmul.mubr.bf16.gmra.mrb[12].mxu1 %v2453_v23 }
  0x97   : > { %2289 = vmatprep.mubr.bf16.mxu0 %v2454_v24  ;;  %2321 = vmatprep.mubr.bf16.mxu1 %v2455_v25 }
  0x9e   : > { %2290 = vmatmul.mubr.bf16.gmra.mrb[16].mxu0 %v2456_v26  ;;  %2322 = vmatmul.mubr.bf16.gmra.mrb[16].mxu1 %v2457_v27 }
  0x9f   : > { %2293 = vmatprep.mubr.bf16.mxu0 %v2458_v28  ;;  %2325 = vmatprep.mubr.bf16.mxu1 %v2459_v29 }
  0xa6   : > { %2294 = vmatmul.mubr.bf16.gmra.mrb[20].mxu0 %v2460_v30  ;;  %2326 = vmatmul.mubr.bf16.gmra.mrb[20].mxu1 %v2461_v31 }
  0xa7   : > { %2297 = vmatprep.mubr.bf16.mxu0 %v2462_v32  ;;  %2329 = vmatprep.mubr.bf16.mxu1 %v2463_v33 }
  0xae   : > { %2298 = vmatmul.mubr.bf16.gmra.mrb[24].mxu0 %v2464_v34  ;;  %2330 = vmatmul.mubr.bf16.gmra.mrb[24].mxu1 %v2465_v35 }
  0xaf   : > { %2301 = vmatprep.mubr.bf16.mxu0 %v2466_v36  ;;  %2333 = vmatprep.mubr.bf16.mxu1 %v2467_v37 }
  0xb6   : > { %2302 = vmatmul.mubr.bf16.gmra.mrb[28].mxu0 %v2468_v38  ;;  %2334 = vmatmul.mubr.bf16.gmra.mrb[28].mxu1 %v2469_v39 }
 0x151   : > { %v2275_v41 = vpop.f32.mrb[0].mxu0  ;;  %v2307_v42 = vpop.f32.mrb[0].mxu1 }
 0x152   : > { %v3238_v43 = vadd.f32 %v2275_v41, %v3235_v40  ;;  %v3241_v44 = vadd.f32 %v2307_v42, %v3235_v40  ;;  %v740_v45 = vpop.f32.mrb[1].mxu0  ;;  %v868_v46 = vpop.f32.mrb[1].mxu1 }
 0x153   : > { %v3244_v47 = vadd.f32 %v3235_v40, %v740_v45  ;;  %v3247_v48 = vadd.f32 %v3235_v40, %v868_v46  ;;  %v2276_v49 = vpop.f32.mrb[2].mxu0  ;;  %v2308_v50 = vpop.f32.mrb[2].mxu1 }
 0x154   : > { %v1327_v51 = vand.u32 2147483647, %v3238_v43  ;;  %v1359_v52 = vand.u32 2147483647, %v3241_v44  ;;  %v3254_v57 = vadd.f32 %v2276_v49, %v3235_v40  ;;  %v3257_v58 = vadd.f32 %v2308_v50, %v3235_v40  ;;  %v743_v59 = vpop.f32.mrb[3].mxu0  ;;  %v871_v60 = vpop.f32.mrb[3].mxu1 }
 0x155   : > { %v1325_v53 = vand.u32 2147483647, %v3244_v47  ;;  %v1357_v54 = vand.u32 2147483647, %v3247_v48  ;;  %v3260_v63 = vadd.f32 %v3235_v40, %v743_v59  ;;  %v3263_v0 = vadd.f32 %v3235_v40, %v871_v60 }
 0x156   : > { %v1391_v55 = vsub.f32 0.0, %v1327_v51  ;;  %v1423_v56 = vsub.f32 0.0, %v1359_v52  ;;  %v1328_v5 = vand.u32 2147483647, %v3254_v57  ;;  %v1360_v6 = vand.u32 2147483647, %v3257_v58 }
 0x157   : > { %v1389_v61 = vsub.f32 0.0, %v1325_v53  ;;  %v1421_v62 = vsub.f32 0.0, %v1357_v54  ;;  %v1326_v7 = vand.u32 2147483647, %v3260_v63  ;;  %v1358_v10 = vand.u32 2147483647, %v3263_v0 }
 0x158   : > { %v1457_v1 = vmul.f32 1.442695, %v1391_v55  ;;  %v1521_v2 = vmul.f32 1.442695, %v1423_v56  ;;  %v1392_v9 = vsub.f32 0.0, %v1328_v5  ;;  %v1424_v13 = vsub.f32 0.0, %v1360_v6 }
 0x159   : > { %v1453_v3 = vmul.f32 1.442695, %v1389_v61  ;;  %v1517_v4 = vmul.f32 1.442695, %v1421_v62  ;;  %v2279_v8 = vpop.f32.mrb[4].mxu0  ;;  %v2311_v11 = vpop.f32.mrb[4].mxu1 }
 0x15a   : > { %2470 = vpow2.f32 %v1457_v1  ;;  %v756_v12 = vpop.f32.mrb[5].mxu0  ;;  %v1390_v14 = vsub.f32 0.0, %v1326_v7  ;;  %v3270_v15 = vadd.f32 %v2279_v8, %v3235_v40  ;;  %v884_v16 = vpop.f32.mrb[5].mxu1  ;;  %v1459_v18 = vmul.f32 1.442695, %v1392_v9 }
 0x15b   : > { %2472 = vpow2.f32 %v1521_v2  ;;  %v2280_v17 = vpop.f32.mrb[6].mxu0  ;;  %v1422_v19 = vsub.f32 0.0, %v1358_v10  ;;  %v3273_v20 = vadd.f32 %v2311_v11, %v3235_v40  ;;  %v2312_v21 = vpop.f32.mrb[6].mxu1  ;;  %v1523_v23 = vmul.f32 1.442695, %v1424_v13 }
 0x15c   : > { %2474 = vpow2.f32 %v1453_v3  ;;  %v759_v22 = vpop.f32.mrb[7].mxu0  ;;  %v1455_v24 = vmul.f32 1.442695, %v1390_v14  ;;  %v3276_v25 = vadd.f32 %v3235_v40, %v756_v12  ;;  %v887_v26 = vpop.f32.mrb[7].mxu1  ;;  %v1331_v28 = vand.u32 2147483647, %v3270_v15 }
 0x15d   : > { %2476 = vpow2.f32 %v1517_v4  ;;  %v1519_v27 = vmul.f32 1.442695, %v1422_v19  ;;  %v1363_v29 = vand.u32 2147483647, %v3273_v20  ;;  %v3282_v32 = vadd.f32 %v3235_v40, %v884_v16 }
 0x15e   : > { %2478 = vpow2.f32 %v1459_v18  ;;  %v1329_v30 = vand.u32 2147483647, %v3276_v25  ;;  %v1395_v31 = vsub.f32 0.0, %v1331_v28  ;;  %v3285_v33 = vadd.f32 %v2280_v17, %v3235_v40 }
 0x15f   : > { %2480 = vpow2.f32 %v1523_v23  ;;  %v1427_v36 = vsub.f32 0.0, %v1363_v29  ;;  %v3296_v42 = vadd.f32 %v2312_v21, %v3235_v40  ;;  %v1361_v49 = vand.u32 2147483647, %v3282_v32 }
 0x160   : > { %2482 = vpow2.f32 %v1455_v24  ;;  %v1465_v39 = vmul.f32 1.442695, %v1395_v31  ;;  %v1393_v41 = vsub.f32 0.0, %v1329_v30  ;;  %v1332_v52 = vand.u32 2147483647, %v3285_v33 }
 0x161   : > { %v3287_v34 = vpop.f32.mrb[8].mxu0  ;;  %v3289_v35 = vpop.f32.mrb[8].mxu1  ;;  %2484 = vpow2.f32 %v1519_v27  ;;  %v1529_v46 = vmul.f32 1.442695, %v1427_v36  ;;  %v3301_v53 = vadd.f32 %v3235_v40, %v759_v22  ;;  %v1364_v3 = vand.u32 2147483647, %v3296_v42 }
 0x162   : > { %v3291_v37 = vpop.f32.mrb[9].mxu0  ;;  %v3293_v38 = vpop.f32.mrb[9].mxu1  ;;  %2486 = vpow2.f32 %v1465_v39  ;;  %v1461_v2 = vmul.f32 1.442695, %v1393_v41  ;;  %v1263_v4 = vmax.f32 %v3238_v43, 0.0  ;;  %v1425_v6 = vsub.f32 0.0, %v1361_v49 }
 0x163   : > { %v3303_v54 = vpop.f32.mrb[10].mxu0  ;;  %v3305_v55 = vpop.f32.mrb[10].mxu1  ;;  %2488 = vpow2.f32 %v1529_v46  ;;  %v1295_v8 = vmax.f32 %v3241_v44, 0.0  ;;  %v1396_v9 = vsub.f32 0.0, %v1332_v52  ;;  %v1330_v10 = vand.u32 2147483647, %v3301_v53 }
 0x164   : > { %v2471_v45 = vpop.eup %2470  ;;  %v3307_v60 = vpop.f32.mrb[11].mxu0  ;;  %v1261_v14 = vmax.f32 %v3244_v47, 0.0  ;;  %v1293_v16 = vmax.f32 %v3247_v48, 0.0  ;;  %v1428_v23 = vsub.f32 0.0, %v1364_v3  ;;  %v3326_v24 = vadd.f32 %v3235_v40, %v887_v26 }
 0x165   : > { %v2473_v50 = vpop.eup %2472  ;;  %v1583_v51 = vadd.f32 1.0, %v2471_v45  ;;  %v3309_v61 = vpop.f32.mrb[11].mxu1  ;;  %v1525_v31 = vmul.f32 1.442695, %v1425_v6  ;;  %v1394_v36 = vsub.f32 0.0, %v1330_v10  ;;  %v3338_v26 = vadd.f32 %v3287_v34, %v3235_v40 }
 0x166   : > { %v2475_v56 = vpop.eup %2474  ;;  %v1615_v59 = vadd.f32 1.0, %v2473_v50  ;;  %v1467_v46 = vmul.f32 1.442695, %v1396_v9  ;;  %v1264_v49 = vmax.f32 %v3254_v57, 0.0  ;;  %v1296_v50 = vmax.f32 %v3257_v58, 0.0 }
 0x167   : > { %v2477_v62 = vpop.eup %2476  ;;  %2490 = vlog2.f32 %v1583_v51  ;;  %v1581_v1 = vadd.f32 1.0, %v2475_v56  ;;  %v1262_v51 = vmax.f32 %v3260_v63, 0.0  ;;  %v1463_v3 = vmul.f32 1.442695, %v1394_v36 }
 0x168   : > { %2492 = vlog2.f32 %v1615_v59  ;;  %v1613_v5 = vadd.f32 1.0, %v2477_v62  ;;  %v2479_v7 = vpop.eup %2478  ;;  %v1531_v59 = vmul.f32 1.442695, %v1428_v23  ;;  %v1362_v62 = vand.u32 2147483647, %v3326_v24 }
 0x169   : > { %2494 = vlog2.f32 %v1581_v1  ;;  %v3315_v11 = vpop.f32.mrb[12].mxu0  ;;  %v3317_v12 = vpop.f32.mrb[12].mxu1  ;;  %v1584_v17 = vadd.f32 1.0, %v2479_v7  ;;  %v3347_v34 = vadd.f32 %v3289_v35, %v3235_v40  ;;  %v1335_v9 = vand.u32 2147483647, %v3338_v26 }
 0x16a   : > { %v2481_v13 = vpop.eup %2480  ;;  %2496 = vlog2.f32 %v1613_v5  ;;  %v3321_v18 = vpop.f32.mrb[13].mxu0 }
 0x16b   : > { %v3323_v19 = vpop.f32.mrb[13].mxu1  ;;  %v2483_v21 = vpop.eup %2482  ;;  %v1616_v22 = vadd.f32 1.0, %v2481_v13  ;;  %2498 = vpow2.f32 %v1461_v2 }
 0x16c   : > { %v3328_v27 = vpop.f32.mrb[14].mxu0  ;;  %v3330_v28 = vpop.f32.mrb[14].mxu1  ;;  %2500 = vlog2.f32 %v1584_v17  ;;  %v1582_v30 = vadd.f32 1.0, %v2483_v21 }
 0x16d   : > { %v2485_v29 = vpop.eup %2484  ;;  %v3332_v39 = vpop.f32.mrb[15].mxu0  ;;  %2502 = vlog2.f32 %v1616_v22 }
 0x16e   : > { %v3334_v41 = vpop.f32.mrb[15].mxu1  ;;  %v1614_v45 = vadd.f32 1.0, %v2485_v29  ;;  %2504 = vlog2.f32 %v1582_v30  ;;  %v2487_v52 = vpop.eup %2486 }
 0x16f   : > { %v2489_v1 = vpop.eup %2488  ;;  %v1587_v2 = vadd.f32 1.0, %v2487_v52 }
 0x170   : > { %2506 = vlog2.f32 %v1614_v45  ;;  %v1619_v7 = vadd.f32 1.0, %v2489_v1  ;;  %v1367_v1 = vand.u32 2147483647, %v3347_v34 }
 0x171   : > { %2508 = vpow2.f32 %v1525_v31  ;;  %v2491_v5 = vpop.eup %2490  ;;  %v3351_v10 = vpop.f32.mrb[16].mxu0  ;;  %v1426_v31 = vsub.f32 0.0, %v1362_v62  ;;  %v1399_v62 = vsub.f32 0.0, %v1335_v9 }
 0x172   : > { %2510 = vpow2.f32 %v1467_v46  ;;  %v3353_v13 = vpop.f32.mrb[16].mxu1  ;;  %v2493_v17 = vpop.eup %2492  ;;  %v1650_v21 = vmul.f32 0.6931472, %v2491_v5 }
 0x173   : > { %2512 = vlog2.f32 %v1587_v2  ;;  %v2495_v35 = vpop.eup %2494  ;;  %v1714_v29 = vmul.f32 0.6931472, %v2493_v17  ;;  %v3358_v36 = vpop.f32.mrb[17].mxu0  ;;  %v3391_v56 = vmul.f32 1.442695, %v1399_v62 }
 0x174   : > { %2514 = vlog2.f32 %v1619_v7  ;;  %v2497_v45 = vpop.eup %2496  ;;  %v1775_v46 = vadd.f32 %v1650_v21, %v1263_v4  ;;  %v1646_v52 = vmul.f32 0.6931472, %v2495_v35  ;;  %v3363_v2 = vpop.f32.mrb[17].mxu1  ;;  %v3377_v35 = vadd.f32 %v3235_v40, %v3291_v37 }
 0x175   : > { %2516 = vpow2.f32 %v1531_v59  ;;  %v3365_v5 = vpop.f32.mrb[18].mxu0  ;;  %v2499_v23 = vpop.eup %2498  ;;  %v1807_v7 = vadd.f32 %v1714_v29, %v1295_v8  ;;  %v1710_v17 = vmul.f32 0.6931472, %v2497_v45  ;;  %v3385_v29 = vadd.f32 %v3235_v40, %v3293_v38 }
 0x176   : > { %2518 = vpow2.f32 %v1463_v3  ;;  %v3369_v30 = vpop.f32.mrb[18].mxu1  ;;  %v3371_v22 = vpop.f32.mrb[19].mxu0  ;;  %v1773_v59 = vadd.f32 %v1646_v52, %v1261_v14  ;;  %v1585_v21 = vadd.f32 1.0, %v2499_v23  ;;  %v3387_v23 = vmul.f32 1.442695, %v1426_v31 }
 0x177   : > { %v2501_v4 = vpop.eup %2500  ;;  %2520 = vtanh.f32 %v1775_v46  ;;  %v3379_v6 = vpop.f32.mrb[19].mxu1  ;;  %v1805_v3 = vadd.f32 %v1710_v17, %v1293_v16  ;;  %v1431_v46 = vsub.f32 0.0, %v1367_v1  ;;  %v1333_v31 = vand.u32 2147483647, %v3377_v35 }
 0x178   : > { %v2503_v8 = vpop.eup %2502  ;;  %2522 = vtanh.f32 %v1807_v7  ;;  %v1652_v9 = vmul.f32 0.6931472, %v2501_v4 }
 0x179   : > { %v2505_v45 = vpop.eup %2504  ;;  %2524 = vtanh.f32 %v1773_v59  ;;  %v1716_v14 = vmul.f32 0.6931472, %v2503_v8  ;;  %v3393_v16 = vpop.f32.mrb[20].mxu0 }
 0x17a   : > { %v2507_v37 = vpop.eup %2506  ;;  %2526 = vtanh.f32 %v1805_v3  ;;  %v1776_v52 = vadd.f32 %v1652_v9, %v1264_v49  ;;  %v1648_v7 = vmul.f32 0.6931472, %v2505_v45  ;;  %3995 = vst [vmem:[#allocation12_spill] sm:$0xff] %v3393_v16  ;;  %v3395_v17 = vpop.f32.mrb[20].mxu1  ;;  %v3408_v9 = vadd.f32 %v3303_v54, %v3235_v40 }
 0x17b   : > { %3996 = vst [vmem:[#allocation13_spill] sm:$0xff] %v3395_v17  ;;  %v2509_v38 = vpop.eup %2508  ;;  %v1808_v4 = vadd.f32 %v1716_v14, %v1296_v50  ;;  %v1712_v59 = vmul.f32 0.6931472, %v2507_v37  ;;  %2528 = vlog2.f32 %v1585_v21  ;;  %v3400_v1 = vpop.f32.mrb[21].mxu0  ;;  %v4001_v14 = vmax.f32 %v3263_v0, 0.0 }
 0x17c   : > { %3997 = vst [vmem:[#allocation14_spill] sm:$0xff] %v3400_v1  ;;  %v3402_v8 = vpop.f32.mrb[21].mxu1  ;;  %v2511_v49 = vpop.eup %2510  ;;  %2530 = vtanh.f32 %v1776_v52  ;;  %v1774_v62 = vadd.f32 %v1648_v7, %v1262_v51  ;;  %v1617_v3 = vadd.f32 1.0, %v2509_v38  ;;  %v3418_v52 = vadd.f32 %v3305_v55, %v3235_v40 }
 0x17d   : > { %3998 = vst [vmem:[#allocation15_spill] sm:$0xff] %v3402_v8  ;;  %v3410_v50 = vpop.f32.mrb[22].mxu0  ;;  %v3412_v21 = vpop.f32.mrb[22].mxu1  ;;  %2532 = vtanh.f32 %v1808_v4  ;;  %v1806_v37 = vadd.f32 %v1712_v59, %v4001_v14  ;;  %v1588_v8 = vadd.f32 1.0, %v2511_v49  ;;  %v3429_v4 = vadd.f32 %v3235_v40, %v3307_v60 }
 0x17e   : > { %3999 = vst [vmem:[#allocation16_spill] sm:$0xff] %v3410_v50  ;;  %4000 = vst [vmem:[#allocation17_spill] sm:$0xff] %v3412_v21  ;;  %v2513_v45 = vpop.eup %2512  ;;  %v3420_v51 = vpop.f32.mrb[23].mxu0  ;;  %2534 = vtanh.f32 %v1774_v62  ;;  %v3425_v50 = vmul.f32 1.442695, %v1431_v46  ;;  %v1397_v14 = vsub.f32 0.0, %v1333_v31 }
 0x17f   : > { %4002 = vst [vmem:[#allocation18_spill] sm:$0xff] %v3420_v51  ;;  %v3422_v7 = vpop.f32.mrb[23].mxu1  ;;  %v2515_v54 = vpop.eup %2514  ;;  %v1658_v38 = vmul.f32 0.6931472, %v2513_v45  ;;  %2536 = vtanh.f32 %v1806_v37  ;;  %v1365_v55 = vand.u32 2147483647, %v3385_v29 }
 0x180   : > { %4003 = vst [vmem:[#allocation19_spill] sm:$0xff] %v3422_v7  ;;  %v2517_v59 = vpop.eup %2516  ;;  %v1722_v49 = vmul.f32 0.6931472, %v2515_v54  ;;  %v4004_v51 = vmax.f32 %v3270_v15, 0.0  ;;  %2538 = vlog2.f32 %v1617_v3  ;;  %v1336_v62 = vand.u32 2147483647, %v3408_v9 }
 0x181   : > { %v2519_v21 = vpop.eup %2518  ;;  %v1620_v1 = vadd.f32 1.0, %v2517_v59  ;;  %v4005_v45 = vmax.f32 %v3273_v20, 0.0  ;;  %2540 = vlog2.f32 %v1588_v8  ;;  %v1368_v37 = vand.u32 2147483647, %v3418_v52 }
 0x182   : > { %v1779_v7 = vadd.f32 %v1658_v38, %v4004_v51  ;;  %v2521_v46 = vpop.eup %2520  ;;  %v1586_v60 = vadd.f32 1.0, %v2519_v21  ;;  %v1334_v16 = vand.u32 2147483647, %v3429_v4  ;;  %v3442_v3 = vadd.f32 %v3235_v40, %v3309_v61  ;;  %v3444_v51 = vpop.f32.mrb[24].mxu0 }
 0x183   : > { %v1811_v17 = vadd.f32 %v1722_v49, %v4005_v45  ;;  %v2523_v31 = vpop.eup %2522  ;;  %v1903_v54 = vmul.f32 %v2521_v46, %v3238_v43  ;;  %v3446_v38 = vpop.f32.mrb[24].mxu1  ;;  %v1429_v21 = vsub.f32 0.0, %v1365_v55  ;;  %v3451_v49 = vadd.f32 %v3315_v11, %v3235_v40 }
 0x184   : > { %2542 = vtanh.f32 %v1779_v7  ;;  %4006 = vst [vmem:[#allocation20_spill] sm:$0xff] %v3446_v38  ;;  %v2525_v59 = vpop.eup %2524  ;;  %v1935_v8 = vmul.f32 %v2523_v31, %v3241_v44  ;;  %v3453_v43 = vpop.f32.mrb[25].mxu0  ;;  %v1469_v61 = vmul.f32 1.442695, %v1397_v14  ;;  %v1398_v14 = vsub.f32 0.0, %v1334_v16 }
 0x185   : > { %2544 = vtanh.f32 %v1811_v17  ;;  %4007 = vst [vmem:[#allocation21_spill] sm:$0xff] %v3453_v43  ;;  %v3455_v7 = vpop.f32.mrb[25].mxu1  ;;  %v2527_v46 = vpop.eup %2526  ;;  %1967 = vst [vmem:[%s3459_s10 + $0x10] sm:$0xff] %v1903_v54  ;;  %v1901_v44 = vmul.f32 %v2525_v59, %v3244_v47  ;;  %v1400_v17 = vsub.f32 0.0, %v1336_v62  ;;  %v1366_v43 = vand.u32 2147483647, %v3442_v3 }
 0x186   : > { %4008 = vst [vmem:[#allocation22_spill] sm:$0xff] %v3455_v7  ;;  %2546 = vlog2.f32 %v1620_v1  ;;  %v3463_v55 = vpop.f32.mrb[26].mxu0  ;;  %v3465_v11 = vpop.f32.mrb[26].mxu1  ;;  %1999 = vst [vmem:[%s3459_s10 + $0x110] sm:$0xff] %v1935_v8  ;;  %v1933_v31 = vmul.f32 %v2527_v46, %v3247_v48  ;;  %v1432_v7 = vsub.f32 0.0, %v1368_v37 }
 0x187   : > { %v2529_v45 = vpop.eup %2528  ;;  %2548 = vlog2.f32 %v1586_v60  ;;  %v3470_v54 = vpop.f32.mrb[27].mxu0  ;;  %1965 = vst [vmem:[%s3459_s10] sm:$0xff] %v1901_v44  ;;  %v1339_v62 = vand.u32 2147483647, %v3451_v49  ;;  %v1268_v60 = vmax.f32 %v3285_v33, 0.0  ;;  %v1533_v37 = vmul.f32 1.442695, %v1429_v21 }
 0x188   : > { %v3472_v38 = vpop.f32.mrb[27].mxu1  ;;  %v2531_v47 = vpop.eup %2530  ;;  %v1654_v1 = vmul.f32 0.6931472, %v2529_v45  ;;  %2550 = vpow2.f32 %v3387_v23  ;;  %1997 = vst [vmem:[%s3459_s10 + $0x100] sm:$0xff] %v1933_v31  ;;  %v4010_v44 = vmax.f32 %v3276_v25, 0.0 }
 0x189   : > { %4009 = vst [vmem:[#allocation23_spill] sm:$0xff] %v3472_v38  ;;  %v2533_v59 = vpop.eup %2532  ;;  %v1904_v48 = vmul.f32 %v2531_v47, %v3254_v57  ;;  %2552 = vpow2.f32 %v3391_v56  ;;  %v1475_v23 = vmul.f32 1.442695, %v1400_v17  ;;  %v1539_v31 = vmul.f32 1.442695, %v1432_v7 }
 0x18a   : > { %v2535_v8 = vpop.eup %2534  ;;  %v1936_v46 = vmul.f32 %v2533_v59, %v3257_v58  ;;  %v1777_v45 = vadd.f32 %v1654_v1, %v4010_v44  ;;  %2554 = vpow2.f32 %v3425_v50  ;;  %v1430_v47 = vsub.f32 0.0, %v1366_v43  ;;  %v3489_v1 = vpop.f32.mrb[28].mxu0 }
 0x18b   : > { %v2537_v16 = vpop.eup %2536  ;;  %1968 = vst [vmem:[%s3459_s10 + $0x18] sm:$0xff] %v1904_v48  ;;  %v1902_v57 = vmul.f32 %v2535_v8, %v3260_v63  ;;  %2556 = vpow2.f32 %v1469_v61  ;;  %v1471_v58 = vmul.f32 1.442695, %v1398_v14  ;;  %v1403_v21 = vsub.f32 0.0, %v1339_v62  ;;  %v3491_v50 = vpop.f32.mrb[28].mxu1 }
 0x18c   : > { %v2539_v38 = vpop.eup %2538  ;;  %2000 = vst [vmem:[%s3459_s10 + $0x118] sm:$0xff] %v1936_v46  ;;  %v1934_v56 = vmul.f32 %v2537_v16, %v3263_v0  ;;  %2558 = vtanh.f32 %v1777_v45  ;;  %v1300_v63 = vmax.f32 %v3296_v42, 0.0  ;;  %v1266_v7 = vmax.f32 %v3301_v53, 0.0  ;;  %v3496_v43 = vpop.f32.mrb[29].mxu0 }
 0x18d   : > { %v2541_v17 = vpop.eup %2540  ;;  %1966 = vst [vmem:[%s3459_s10 + $0x8] sm:$0xff] %v1902_v57  ;;  %v1718_v59 = vmul.f32 0.6931472, %v2539_v38  ;;  %2560 = vpow2.f32 %v1533_v37  ;;  %v3502_v62 = vadd.f32 %v3317_v12, %v3235_v40  ;;  %v3504_v48 = vpop.f32.mrb[29].mxu1  ;;  %v4012_v46 = vmax.f32 %v3282_v32, 0.0 }
 0x18e   : > { %v2543_v61 = vpop.eup %2542  ;;  %1998 = vst [vmem:[%s3459_s10 + $0x108] sm:$0xff] %v1934_v56  ;;  %v1660_v0 = vmul.f32 0.6931472, %v2541_v17  ;;  %2562 = vpow2.f32 %v1475_v23  ;;  %v3506_v38 = vpop.f32.mrb[30].mxu0  ;;  %v1535_v45 = vmul.f32 1.442695, %v1430_v47  ;;  %v3522_v47 = vadd.f32 %v3235_v40, %v3321_v18 }
 0x18f   : > { %4011 = vst [vmem:[#allocation24_spill] sm:$0xff] %v3506_v38  ;;  %v2545_v8 = vpop.eup %2544  ;;  %v1907_v37 = vmul.f32 %v2543_v61, %v3270_v15  ;;  %v1809_v44 = vadd.f32 %v1718_v59, %v4012_v46  ;;  %2564 = vpow2.f32 %v1539_v31  ;;  %v3511_v16 = vpop.f32.mrb[30].mxu1  ;;  %v1481_v17 = vmul.f32 1.442695, %v1403_v21 }
 0x190   : > { %v3513_v23 = vpop.f32.mrb[31].mxu0  ;;  %v2547_v12 = vpop.eup %2546  ;;  %v1939_v57 = vmul.f32 %v2545_v8, %v3273_v20  ;;  %v1780_v56 = vadd.f32 %v1660_v0, %v1268_v60  ;;  %2566 = vpow2.f32 %v1471_v58  ;;  %v1271_v31 = vmax.f32 %v3338_v26, 0.0 }
 0x191   : > { %v3516_v14 = vpop.f32.mrb[31].mxu1  ;;  %v2549_v38 = vpop.eup %2548  ;;  %1971 = vst [vmem:[%s3459_s10 + $0x30] sm:$0xff] %v1907_v37  ;;  %2568 = vtanh.f32 %v1809_v44  ;;  %v1724_v15 = vmul.f32 0.6931472, %v2547_v12  ;;  %v1303_v20 = vmax.f32 %v3347_v34, 0.0  ;;  %v3529_v8 = vadd.f32 %v3235_v40, %v3323_v19 }
 0x192   : > { %v2551_v59 = vpop.eup %2550  ;;  %2003 = vst [vmem:[%s3459_s10 + $0x130] sm:$0xff] %v1939_v57  ;;  %2570 = vtanh.f32 %v1780_v56  ;;  %v1656_v61 = vmul.f32 0.6931472, %v2549_v38  ;;  %v1371_v60 = vand.u32 2147483647, %v3502_v62  ;;  %v3533_v44 = vadd.f32 %v3328_v27, %v3235_v40 }
 0x193   : > { %v2553_v58 = vpop.eup %2552  ;;  %v1812_v21 = vadd.f32 %v1724_v15, %v1300_v63  ;;  %v1618_v0 = vadd.f32 1.0, %v2551_v59  ;;  %2572 = vpow2.f32 %v1535_v45  ;;  %v1337_v57 = vand.u32 2147483647, %v3522_v47 }
 0x194   : > { %v2555_v37 = vpop.eup %2554  ;;  %v1778_v46 = vadd.f32 %v1656_v61, %v1266_v7  ;;  %v1591_v18 = vadd.f32 1.0, %v2553_v58  ;;  %2574 = vpow2.f32 %v1481_v17  ;;  %v3538_v63 = vadd.f32 %v3330_v28, %v3235_v40 }
 0x195   : > { %v2557_v38 = vpop.eup %2556  ;;  %2576 = vtanh.f32 %v1812_v21  ;;  %v1623_v12 = vadd.f32 1.0, %v2555_v37  ;;  %v1435_v56 = vsub.f32 0.0, %v1371_v60  ;;  %v1369_v59 = vand.u32 2147483647, %v3529_v8 }
 0x196   : > { %v2559_v45 = vpop.eup %2558  ;;  %2578 = vtanh.f32 %v1778_v46  ;;  %v1589_v7 = vadd.f32 1.0, %v2557_v38  ;;  %v1340_v21 = vand.u32 2147483647, %v3533_v44  ;;  %v1401_v60 = vsub.f32 0.0, %v1337_v57 }
 0x197   : > { %v2561_v17 = vpop.eup %2560  ;;  %v1905_v27 = vmul.f32 %v2559_v45, %v3276_v25  ;;  %2580 = vlog2.f32 %v1618_v0  ;;  %v1372_v38 = vand.u32 2147483647, %v3538_v63  ;;  %v1545_v45 = vmul.f32 1.442695, %v1435_v56 }
 0x198   : > { %v2563_v61 = vpop.eup %2562  ;;  %2582 = vlog2.f32 %v1591_v18  ;;  %v1621_v58 = vadd.f32 1.0, %v2561_v17  ;;  %v3550_v15 = vadd.f32 %v3235_v40, %v3332_v39  ;;  %v1433_v28 = vsub.f32 0.0, %v1369_v59 }
 0x199   : > { %v2565_v37 = vpop.eup %2564  ;;  %1969 = vst [vmem:[%s3459_s10 + $0x20] sm:$0xff] %v1905_v27  ;;  %2584 = vlog2.f32 %v1623_v12  ;;  %v1592_v46 = vadd.f32 1.0, %v2563_v61  ;;  %v3554_v12 = vadd.f32 %v3235_v40, %v3334_v41  ;;  %v1404_v56 = vsub.f32 0.0, %v1340_v21 }
 0x19a   : > { %v2567_v25 = vpop.eup %2566  ;;  %2586 = vlog2.f32 %v1589_v7  ;;  %v1624_v0 = vadd.f32 1.0, %v2565_v37  ;;  %v1304_v7 = vmax.f32 %v3418_v52, 0.0  ;;  %v1436_v37 = vsub.f32 0.0, %v1372_v38 }
 0x19b   : > { %v2569_v18 = vpop.eup %2568  ;;  %2588 = vlog2.f32 %v1621_v58  ;;  %v1590_v17 = vadd.f32 1.0, %v2567_v25  ;;  %v1270_v58 = vmax.f32 %v3429_v4, 0.0  ;;  %v1477_v25 = vmul.f32 1.442695, %v1401_v60 }
 0x19c   : > { %v2571_v57 = vpop.eup %2570  ;;  %v1937_v27 = vmul.f32 %v2569_v18, %v3282_v32  ;;  %2590 = vlog2.f32 %v1592_v46  ;;  %v1338_v19 = vand.u32 2147483647, %v3550_v15  ;;  %v1541_v21 = vmul.f32 1.442695, %v1433_v28 }
 0x19d   : > { %v2573_v61 = vpop.eup %2572  ;;  %v1908_v39 = vmul.f32 %v2571_v57, %v3285_v33  ;;  %2592 = vlog2.f32 %v1624_v0  ;;  %v1370_v18 = vand.u32 2147483647, %v3554_v12  ;;  %v1483_v38 = vmul.f32 1.442695, %v1404_v56 }
 0x19e   : > { %v2575_v59 = vpop.eup %2574  ;;  %2001 = vst [vmem:[%s3459_s10 + $0x120] sm:$0xff] %v1937_v27  ;;  %2594 = vlog2.f32 %v1590_v17  ;;  %v1622_v41 = vadd.f32 1.0, %v2573_v61  ;;  %v3567_v17 = vadd.f32 %v3351_v10, %v3235_v40  ;;  %v1302_v27 = vmax.f32 %v3442_v3, 0.0 }
 0x19f   : > { %v2577_v32 = vpop.eup %2576  ;;  %1972 = vst [vmem:[%s3459_s10 + $0x38] sm:$0xff] %v1908_v39  ;;  %v1595_v46 = vadd.f32 1.0, %v2575_v59  ;;  %2596 = vpow2.f32 %v1545_v45  ;;  %v1547_v45 = vmul.f32 1.442695, %v1436_v37  ;;  %v1275_v39 = vmax.f32 %v3451_v49, 0.0 }
 0x1a0   : > { %v2579_v33 = vpop.eup %2578  ;;  %v1940_v0 = vmul.f32 %v2577_v32, %v3296_v42  ;;  %2598 = vlog2.f32 %v1622_v41  ;;  %v1402_v42 = vsub.f32 0.0, %v1338_v19  ;;  %v1434_v41 = vsub.f32 0.0, %v1370_v18 }
 0x1a1   : > { %v2581_v60 = vpop.eup %2580  ;;  %v1906_v57 = vmul.f32 %v2579_v33, %v3301_v53  ;;  %2600 = vlog2.f32 %v1595_v46  ;;  %v4013_v53 = vmax.f32 %v3326_v24, 0.0  ;;  %v1343_v37 = vand.u32 2147483647, %v3567_v17 }
 0x1a2   : > { %v2583_v28 = vpop.eup %2582  ;;  %2004 = vst [vmem:[%s3459_s10 + $0x138] sm:$0xff] %v1940_v0  ;;  %v1720_v61 = vmul.f32 0.6931472, %v2581_v60  ;;  %2602 = vpow2.f32 %v1477_v25  ;;  %v3582_v60 = vadd.f32 %v3353_v13, %v3235_v40  ;;  %v4015_v13 = vmax.f32 %v3385_v29, 0.0 }
 0x1a3   : > { %v2585_v59 = vpop.eup %2584  ;;  %1970 = vst [vmem:[%s3459_s10 + $0x28] sm:$0xff] %v1906_v57  ;;  %v1666_v56 = vmul.f32 0.6931472, %v2583_v28  ;;  %2604 = vpow2.f32 %v1541_v21  ;;  %v3586_v28 = vmul.f32 1.442695, %v1402_v42 }
 0x1a4   : > { %v2587_v32 = vpop.eup %2586  ;;  %v1810_v33 = vadd.f32 %v1720_v61, %v4013_v53  ;;  %v1730_v46 = vmul.f32 0.6931472, %v2585_v59  ;;  %2606 = vpow2.f32 %v1483_v38  ;;  %v4014_v61 = vmax.f32 %v3377_v35, 0.0 }
 0x1a5   : > { %v2589_v0 = vpop.eup %2588  ;;  %v1783_v25 = vadd.f32 %v1666_v56, %v1271_v31  ;;  %v1662_v19 = vmul.f32 0.6931472, %v2587_v32  ;;  %2608 = vpow2.f32 %v1547_v45  ;;  %v3590_v56 = vmul.f32 1.442695, %v1434_v41 }
 0x1a6   : > { %v2591_v21 = vpop.eup %2590  ;;  %2610 = vtanh.f32 %v1810_v33  ;;  %v1815_v18 = vadd.f32 %v1730_v46, %v1303_v20  ;;  %v1726_v57 = vmul.f32 0.6931472, %v2589_v0  ;;  %v1407_v33 = vsub.f32 0.0, %v1343_v37 }
 0x1a7   : > { %v2593_v38 = vpop.eup %2592  ;;  %2612 = vtanh.f32 %v1783_v25  ;;  %v1781_v59 = vadd.f32 %v1662_v19, %v4014_v61  ;;  %v1668_v31 = vmul.f32 0.6931472, %v2591_v21  ;;  %v4016_v20 = vmax.f32 %v3408_v9, 0.0 }
 0x1a8   : > { %v2595_v45 = vpop.eup %2594  ;;  %2614 = vtanh.f32 %v1815_v18  ;;  %v1813_v32 = vadd.f32 %v1726_v57, %v4015_v13  ;;  %v1732_v53 = vmul.f32 0.6931472, %v2593_v38  ;;  %v3598_v0 = vadd.f32 %v3235_v40, %v3358_v36 }
 0x1a9   : > { %v2597_v10 = vpop.eup %2596  ;;  %2616 = vtanh.f32 %v1781_v59  ;;  %v1784_v42 = vadd.f32 %v1668_v31, %v4016_v20  ;;  %v1664_v46 = vmul.f32 0.6931472, %v2595_v45  ;;  %v3604_v21 = vadd.f32 %v3235_v40, %v3363_v2 }
 0x1aa   : > { %v2599_v25 = vpop.eup %2598  ;;  %2618 = vtanh.f32 %v1813_v32  ;;  %v1816_v41 = vadd.f32 %v1732_v53, %v1304_v7  ;;  %v1627_v19 = vadd.f32 1.0, %v2597_v10  ;;  %v1375_v38 = vand.u32 2147483647, %v3582_v60 }
 0x1ab   : > { %v2601_v37 = vpop.eup %2600  ;;  %2620 = vtanh.f32 %v1784_v42  ;;  %v1782_v18 = vadd.f32 %v1664_v46, %v1270_v58  ;;  %v1728_v57 = vmul.f32 0.6931472, %v2599_v25  ;;  %v3611_v59 = vadd.f32 %v3365_v5, %v3235_v40 }
 0x1ac   : > { %v2603_v36 = vpop.eup %2602  ;;  %2622 = vtanh.f32 %v1816_v41  ;;  %v1674_v61 = vmul.f32 0.6931472, %v2601_v37  ;;  %v3615_v7 = vadd.f32 %v3369_v30, %v3235_v40  ;;  %v1341_v58 = vand.u32 2147483647, %v3598_v0 }
 0x1ad   : > { %v2605_v2 = vpop.eup %2604  ;;  %2624 = vtanh.f32 %v1782_v18  ;;  %v1814_v10 = vadd.f32 %v1728_v57, %v1302_v27  ;;  %v1593_v31 = vadd.f32 1.0, %v2603_v36  ;;  %v1373_v53 = vand.u32 2147483647, %v3604_v21 }
 0x1ae   : > { %v2607_v45 = vpop.eup %2606  ;;  %v1787_v13 = vadd.f32 %v1674_v61, %v1275_v39  ;;  %2626 = vlog2.f32 %v1627_v19  ;;  %v1625_v32 = vadd.f32 1.0, %v2605_v2  ;;  %v1439_v42 = vsub.f32 0.0, %v1375_v38 }
 0x1af   : > { %v2609_v20 = vpop.eup %2608  ;;  %2628 = vtanh.f32 %v1814_v10  ;;  %v1596_v5 = vadd.f32 1.0, %v2607_v45  ;;  %v1344_v46 = vand.u32 2147483647, %v3611_v59  ;;  %v1376_v27 = vand.u32 2147483647, %v3615_v7 }
 0x1b0   : > { %v2611_v30 = vpop.eup %2610  ;;  %2630 = vtanh.f32 %v1787_v13  ;;  %v1628_v25 = vadd.f32 1.0, %v2609_v20  ;;  %v3623_v41 = vadd.f32 %v3235_v40, %v3371_v22  ;;  %v1405_v37 = vsub.f32 0.0, %v1341_v58 }
 0x1b1   : > { %v2613_v39 = vpop.eup %2612  ;;  %v1938_v19 = vmul.f32 %v2611_v30, %v3326_v24  ;;  %2632 = vlog2.f32 %v1593_v31  ;;  %v3628_v18 = vadd.f32 %v3235_v40, %v3379_v6  ;;  %v1489_v36 = vmul.f32 1.442695, %v1407_v33 }
 0x1b2   : > { %v2615_v57 = vpop.eup %2614  ;;  %v1911_v38 = vmul.f32 %v2613_v39, %v3338_v26  ;;  %2634 = vlog2.f32 %v1625_v32  ;;  %v1437_v61 = vsub.f32 0.0, %v1373_v53  ;;  %v1408_v24 = vsub.f32 0.0, %v1344_v46 }
 0x1b3   : > { %v2617_v2 = vpop.eup %2616  ;;  %2002 = vst [vmem:[%s3459_s10 + $0x128] sm:$0xff] %v1938_v19  ;;  %v1943_v22 = vmul.f32 %v2615_v57, %v3347_v34  ;;  %2636 = vlog2.f32 %v1596_v5  ;;  %v1342_v10 = vand.u32 2147483647, %v3623_v41  ;;  %v1553_v26 = vmul.f32 1.442695, %v1439_v42 }
 0x1b4   : > { %v2619_v31 = vpop.eup %2618  ;;  %1975 = vst [vmem:[%s3459_s10 + $0x50] sm:$0xff] %v1911_v38  ;;  %v1909_v40 = vmul.f32 %v2617_v2, %v3377_v35  ;;  %2638 = vlog2.f32 %v1628_v25  ;;  %v1440_v6 = vsub.f32 0.0, %v1376_v27  ;;  %v1485_v34 = vmul.f32 1.442695, %v1405_v37 }
 0x1b5   : > { %v2621_v58 = vpop.eup %2620  ;;  %2007 = vst [vmem:[%s3459_s10 + $0x150] sm:$0xff] %v1943_v22  ;;  %v1941_v33 = vmul.f32 %v2619_v31, %v3385_v29  ;;  %2640 = vpow2.f32 %v3586_v28  ;;  %v1374_v45 = vand.u32 2147483647, %v3628_v18  ;;  %v1549_v35 = vmul.f32 1.442695, %v1437_v61 }
 0x1b6   : > { %v2623_v13 = vpop.eup %2622  ;;  %1973 = vst [vmem:[%s3459_s10 + $0x40] sm:$0xff] %v1909_v40  ;;  %v1912_v32 = vmul.f32 %v2621_v58, %v3408_v9  ;;  %2642 = vpow2.f32 %v3590_v56  ;;  %v1406_v53 = vsub.f32 0.0, %v1342_v10  ;;  %v1491_v29 = vmul.f32 1.442695, %v1408_v24 }
 0x1b7   : > { %v2625_v20 = vpop.eup %2624  ;;  %2005 = vst [vmem:[%s3459_s10 + $0x140] sm:$0xff] %v1941_v33  ;;  %v1944_v5 = vmul.f32 %v2623_v13, %v3418_v52  ;;  %2644 = vpow2.f32 %v1489_v36  ;;  %v1438_v28 = vsub.f32 0.0, %v1374_v45  ;;  %v1273_v30 = vmax.f32 %v3522_v47, 0.0  ;;  %v4018_v45 = vld [vmem:[#allocation12_spill] sm:$0xff] }
 0x1b8   : > { %v2627_v42 = vpop.eup %2626  ;;  %1976 = vst [vmem:[%s3459_s10 + $0x58] sm:$0xff] %v1912_v32  ;;  %v1910_v46 = vmul.f32 %v2625_v20, %v3429_v4  ;;  %2646 = vpow2.f32 %v1553_v26  ;;  %v1555_v9 = vmul.f32 1.442695, %v1440_v6  ;;  %v1305_v27 = vmax.f32 %v3529_v8, 0.0  ;;  %v4019_v20 = vld [vmem:[#allocation13_spill] sm:$0xff] }
 0x1b9   : > { %v2629_v56 = vpop.eup %2628  ;;  %2008 = vst [vmem:[%s3459_s10 + $0x158] sm:$0xff] %v1944_v5  ;;  %v1738_v25 = vmul.f32 0.6931472, %v2627_v42  ;;  %v1276_v52 = vmax.f32 %v3533_v44, 0.0  ;;  %2648 = vpow2.f32 %v1485_v34  ;;  %v1308_v4 = vmax.f32 %v3538_v63, 0.0 }
 0x1ba   : > { %v2631_v39 = vpop.eup %2630  ;;  %1974 = vst [vmem:[%s3459_s10 + $0x48] sm:$0xff] %v1910_v46  ;;  %v1942_v19 = vmul.f32 %v2629_v56, %v3442_v3  ;;  %2650 = vpow2.f32 %v1549_v35  ;;  %v1487_v37 = vmul.f32 1.442695, %v1406_v53  ;;  %v4017_v36 = vmax.f32 %v3502_v62, 0.0  ;;  %v3666_v34 = vld [vmem:[%s3976_s2] ss:$0 sm:$0xff] }
 0x1bb   : > { %v2633_v57 = vpop.eup %2632  ;;  %v1915_v38 = vmul.f32 %v2631_v39, %v3451_v49  ;;  %2652 = vpow2.f32 %v1491_v29  ;;  %v1551_v2 = vmul.f32 1.442695, %v1438_v28  ;;  %v1274_v10 = vmax.f32 %v3550_v15, 0.0  ;;  %v4020_v46 = vld [vmem:[#allocation14_spill] sm:$0xff]  ;;  %v4021_v39 = vld [vmem:[#allocation15_spill] sm:$0xff] }
 0x1bc   : > { %v1819_v61 = vadd.f32 %v1738_v25, %v4017_v36  ;;  %v2635_v22 = vpop.eup %2634  ;;  %2006 = vst [vmem:[%s3459_s10 + $0x148] sm:$0xff] %v1942_v19  ;;  %v1670_v24 = vmul.f32 0.6931472, %v2633_v57  ;;  %v1306_v3 = vmax.f32 %v3554_v12, 0.0  ;;  %2654 = vpow2.f32 %v1555_v9 }
 0x1bd   : > { %v2637_v31 = vpop.eup %2636  ;;  %1979 = vst [vmem:[%s3459_s10 + $0x70] sm:$0xff] %v1915_v38  ;;  %v1734_v40 = vmul.f32 0.6931472, %v2635_v22  ;;  %v1279_v26 = vmax.f32 %v3567_v17, 0.0  ;;  %v1311_v49 = vmax.f32 %v3582_v60, 0.0  ;;  %v3670_v13 = vadd.f32 %v3666_v34, %v4018_v45  ;;  %v4023_v45 = vld [vmem:[#allocation17_spill] sm:$0xff] }
 0x1be   : > { %2656 = vtanh.f32 %v1819_v61  ;;  %v2639_v6 = vpop.eup %2638  ;;  %v1785_v58 = vadd.f32 %v1670_v24, %v1273_v30  ;;  %v1676_v33 = vmul.f32 0.6931472, %v2637_v31  ;;  %v3674_v5 = vadd.f32 %v3666_v34, %v4019_v20 }
 0x1bf   : > { %2658 = vpow2.f32 %v1487_v37  ;;  %v2641_v32 = vpop.eup %2640  ;;  %v1817_v35 = vadd.f32 %v1734_v40, %v1305_v27  ;;  %v1740_v53 = vmul.f32 0.6931472, %v2639_v6  ;;  %v3678_v30 = vadd.f32 %v3666_v34, %v4020_v46 }
 0x1c0   : > { %2660 = vpow2.f32 %v1551_v2  ;;  %v2643_v29 = vpop.eup %2642  ;;  %v1788_v28 = vadd.f32 %v1676_v33, %v1276_v52  ;;  %v1594_v42 = vadd.f32 1.0, %v2641_v32  ;;  %v3682_v27 = vadd.f32 %v3666_v34, %v4021_v39  ;;  %v4022_v2 = vld [vmem:[#allocation16_spill] sm:$0xff] }
 0x1c1   : > { %2662 = vtanh.f32 %v1785_v58  ;;  %v2645_v9 = vpop.eup %2644  ;;  %v1820_v56 = vadd.f32 %v1740_v53, %v1308_v4  ;;  %v1626_v25 = vadd.f32 1.0, %v2643_v29  ;;  %v1277_v57 = vmax.f32 %v3598_v0, 0.0 }
 0x1c2   : > { %2664 = vtanh.f32 %v1817_v35  ;;  %v2647_v19 = vpop.eup %2646  ;;  %v1599_v37 = vadd.f32 1.0, %v2645_v9  ;;  %v1347_v52 = vand.u32 2147483647, %v3670_v13  ;;  %v1379_v61 = vand.u32 2147483647, %v3674_v5  ;;  %v4024_v9 = vld [vmem:[#allocation18_spill] sm:$0xff] }
 0x1c3   : > { %2666 = vtanh.f32 %v1788_v28  ;;  %v2649_v38 = vpop.eup %2648  ;;  %v1631_v36 = vadd.f32 1.0, %v2647_v19  ;;  %v3689_v4 = vadd.f32 %v3666_v34, %v4022_v2  ;;  %v1309_v31 = vmax.f32 %v3604_v21, 0.0 }
 0x1c4   : > { %2668 = vtanh.f32 %v1820_v56  ;;  %v2651_v22 = vpop.eup %2650  ;;  %v1597_v24 = vadd.f32 1.0, %v2649_v38  ;;  %v1345_v40 = vand.u32 2147483647, %v3678_v30  ;;  %v1377_v33 = vand.u32 2147483647, %v3682_v27 }
 0x1c5   : > { %2670 = vlog2.f32 %v1594_v42  ;;  %v2653_v6 = vpop.eup %2652  ;;  %v1629_v58 = vadd.f32 1.0, %v2651_v22  ;;  %v3696_v32 = vadd.f32 %v3666_v34, %v4023_v45  ;;  %v1411_v20 = vsub.f32 0.0, %v1347_v52 }
 0x1c6   : > { %2672 = vlog2.f32 %v1626_v25  ;;  %v2655_v35 = vpop.eup %2654  ;;  %v1600_v53 = vadd.f32 1.0, %v2653_v6  ;;  %v1348_v29 = vand.u32 2147483647, %v3689_v4  ;;  %v1443_v46 = vsub.f32 0.0, %v1379_v61 }
 0x1c7   : > { %2674 = vlog2.f32 %v1599_v37  ;;  %v1632_v42 = vadd.f32 1.0, %v2655_v35  ;;  %v3701_v56 = vadd.f32 %v3666_v34, %v4024_v9  ;;  %v1280_v19 = vmax.f32 %v3611_v59, 0.0 }
 0x1c8   : > { %v2657_v28 = vpop.eup %2656  ;;  %2676 = vlog2.f32 %v1631_v36  ;;  %v1409_v37 = vsub.f32 0.0, %v1345_v40  ;;  %v1441_v2 = vsub.f32 0.0, %v1377_v33  ;;  %v1380_v22 = vand.u32 2147483647, %v3696_v32 }
 0x1c9   : > { %v2659_v25 = vpop.eup %2658  ;;  %v1947_v39 = vmul.f32 %v2657_v28, %v3502_v62  ;;  %2678 = vlog2.f32 %v1597_v24  ;;  %v1497_v6 = vmul.f32 1.442695, %v1411_v20  ;;  %v1412_v45 = vsub.f32 0.0, %v1348_v29 }
 0x1ca   : > { %v2661_v38 = vpop.eup %2660  ;;  %2680 = vlog2.f32 %v1629_v58  ;;  %v1598_v52 = vadd.f32 1.0, %v2659_v25  ;;  %v1561_v24 = vmul.f32 1.442695, %v1443_v46  ;;  %v1346_v40 = vand.u32 2147483647, %v3701_v56 }
 0x1cb   : > { %v2663_v36 = vpop.eup %2662  ;;  %2011 = vst [vmem:[%s3459_s10 + $0x170] sm:$0xff] %v1947_v39  ;;  %2682 = vlog2.f32 %v1600_v53  ;;  %v1630_v61 = vadd.f32 1.0, %v2661_v38  ;;  %v1312_v28 = vmax.f32 %v3615_v7, 0.0  ;;  %v1493_v9 = vmul.f32 1.442695, %v1409_v37 }
 0x1cc   : > { %v2665_v35 = vpop.eup %2664  ;;  %v1913_v62 = vmul.f32 %v2663_v36, %v3522_v47  ;;  %2684 = vlog2.f32 %v1632_v42  ;;  %v1557_v47 = vmul.f32 1.442695, %v1441_v2  ;;  %v1444_v29 = vsub.f32 0.0, %v1380_v22 }
 0x1cd   : > { %v2667_v58 = vpop.eup %2666  ;;  %v1945_v33 = vmul.f32 %v2665_v35, %v3529_v8  ;;  %2686 = vlog2.f32 %v1598_v52  ;;  %v1499_v25 = vmul.f32 1.442695, %v1412_v45  ;;  %v4025_v8 = vld [vmem:[#allocation19_spill] sm:$0xff]  ;;  %v1278_v52 = vmax.f32 %v3623_v41, 0.0 }
 0x1ce   : > { %v2669_v53 = vpop.eup %2668  ;;  %1977 = vst [vmem:[%s3459_s10 + $0x60] sm:$0xff] %v1913_v62  ;;  %v1916_v20 = vmul.f32 %v2667_v58, %v3533_v44  ;;  %2688 = vlog2.f32 %v1630_v61  ;;  %v3717_v39 = vadd.f32 %v3666_v34, %v4025_v8  ;;  %v1410_v44 = vsub.f32 0.0, %v1346_v40 }
 0x1cf   : > { %v2671_v42 = vpop.eup %2670  ;;  %2009 = vst [vmem:[%s3459_s10 + $0x160] sm:$0xff] %v1945_v33  ;;  %v1948_v46 = vmul.f32 %v2669_v53, %v3538_v63  ;;  %2690 = vpow2.f32 %v1497_v6  ;;  %v1310_v22 = vmax.f32 %v3628_v18, 0.0  ;;  %v3725_v63 = vadd.f32 %v3666_v34, %v3444_v51 }
 0x1d0   : > { %v2673_v38 = vpop.eup %2672  ;;  %1980 = vst [vmem:[%s3459_s10 + $0x78] sm:$0xff] %v1916_v20  ;;  %v1672_v37 = vmul.f32 0.6931472, %v2671_v42  ;;  %2692 = vpow2.f32 %v1561_v24  ;;  %v3729_v35 = vmul.f32 1.442695, %v1444_v29 }
 0x1d1   : > { %v2675_v36 = vpop.eup %2674  ;;  %2012 = vst [vmem:[%s3459_s10 + $0x178] sm:$0xff] %v1948_v46  ;;  %v1736_v2 = vmul.f32 0.6931472, %v2673_v38  ;;  %2694 = vpow2.f32 %v1493_v9  ;;  %v1378_v58 = vand.u32 2147483647, %v3717_v39 }
 0x1d2   : > { %v2677_v61 = vpop.eup %2676  ;;  %v1786_v6 = vadd.f32 %v1672_v37, %v1274_v10  ;;  %v1682_v45 = vmul.f32 0.6931472, %v2675_v36  ;;  %2696 = vpow2.f32 %v1557_v47  ;;  %v3736_v53 = vmul.f32 1.442695, %v1410_v44 }
 0x1d3   : > { %v2679_v62 = vpop.eup %2678  ;;  %v1818_v24 = vadd.f32 %v1736_v2, %v1306_v3  ;;  %v1746_v40 = vmul.f32 0.6931472, %v2677_v61  ;;  %2698 = vpow2.f32 %v1499_v25  ;;  %v1351_v3 = vand.u32 2147483647, %v3725_v63  ;;  %v4026_v25 = vld [vmem:[#allocation20_spill] sm:$0xff]  ;;  %v4027_v61 = vld [vmem:[#allocation21_spill] sm:$0xff] }
 0x1d4   : > { %v2681_v33 = vpop.eup %2680  ;;  %2700 = vtanh.f32 %v1786_v6  ;;  %v1791_v51 = vadd.f32 %v1682_v45, %v1279_v26  ;;  %v1678_v9 = vmul.f32 0.6931472, %v2679_v62  ;;  %v3745_v26 = vadd.f32 %v3666_v34, %v4026_v25 }
 0x1d5   : > { %v2683_v10 = vpop.eup %2682  ;;  %2702 = vtanh.f32 %v1818_v24  ;;  %v1823_v20 = vadd.f32 %v1746_v40, %v1311_v49  ;;  %v1742_v47 = vmul.f32 0.6931472, %v2681_v33  ;;  %v1442_v49 = vsub.f32 0.0, %v1378_v58  ;;  %v4028_v33 = vld [vmem:[#allocation22_spill] sm:$0xff] }
 0x1d6   : > { %v2685_v29 = vpop.eup %2684  ;;  %2704 = vtanh.f32 %v1791_v51  ;;  %v1789_v42 = vadd.f32 %v1678_v9, %v1277_v57  ;;  %v1684_v46 = vmul.f32 0.6931472, %v2683_v10  ;;  %v3753_v57 = vadd.f32 %v3666_v34, %v4027_v61 }
 0x1d7   : > { %v2687_v8 = vpop.eup %2686  ;;  %2706 = vtanh.f32 %v1823_v20  ;;  %v1821_v38 = vadd.f32 %v1742_v47, %v1309_v31  ;;  %v1748_v37 = vmul.f32 0.6931472, %v2685_v29  ;;  %v1415_v24 = vsub.f32 0.0, %v1351_v3 }
 0x1d8   : > { %v2689_v44 = vpop.eup %2688  ;;  %2708 = vtanh.f32 %v1789_v42  ;;  %v1792_v36 = vadd.f32 %v1684_v46, %v1280_v19  ;;  %v1680_v2 = vmul.f32 0.6931472, %v2687_v8  ;;  %v3759_v51 = vadd.f32 %v3666_v34, %v4028_v33 }
 0x1d9   : > { %v2691_v6 = vpop.eup %2690  ;;  %2710 = vtanh.f32 %v1821_v38  ;;  %v1824_v45 = vadd.f32 %v1748_v37, %v1312_v28  ;;  %v1744_v62 = vmul.f32 0.6931472, %v2689_v44  ;;  %v1383_v20 = vand.u32 2147483647, %v3745_v26 }
 0x1da   : > { %v2693_v31 = vpop.eup %2692  ;;  %2712 = vtanh.f32 %v1792_v36  ;;  %v1790_v40 = vadd.f32 %v1680_v2, %v1278_v52  ;;  %v1603_v58 = vadd.f32 1.0, %v2691_v6  ;;  %v1349_v28 = vand.u32 2147483647, %v3753_v57 }
 0x1db   : > { %v2695_v19 = vpop.eup %2694  ;;  %2714 = vtanh.f32 %v1824_v45  ;;  %v1822_v9 = vadd.f32 %v1744_v62, %v1310_v22  ;;  %v1635_v10 = vadd.f32 1.0, %v2693_v31  ;;  %v1381_v3 = vand.u32 2147483647, %v3759_v51 }
 0x1dc   : > { %v2697_v47 = vpop.eup %2696  ;;  %2716 = vtanh.f32 %v1790_v40  ;;  %v1601_v29 = vadd.f32 1.0, %v2695_v19  ;;  %v3766_v46 = vadd.f32 %v3666_v34, %v3463_v55  ;;  %v3770_v22 = vadd.f32 %v3666_v34, %v3465_v11 }
 0x1dd   : > { %v2699_v42 = vpop.eup %2698  ;;  %2718 = vtanh.f32 %v1822_v9  ;;  %v1633_v52 = vadd.f32 1.0, %v2697_v47  ;;  %v1559_v38 = vmul.f32 1.442695, %v1442_v49  ;;  %v3774_v37 = vadd.f32 %v3666_v34, %v3470_v54 }
 0x1de   : > { %v2701_v25 = vpop.eup %2700  ;;  %2720 = vlog2.f32 %v1603_v58  ;;  %v1604_v8 = vadd.f32 1.0, %v2699_v42  ;;  %v1447_v55 = vsub.f32 0.0, %v1383_v20  ;;  %v1352_v2 = vand.u32 2147483647, %v3766_v46 }
 0x1df   : > { %v2703_v44 = vpop.eup %2702  ;;  %v1914_v36 = vmul.f32 %v2701_v25, %v3550_v15  ;;  %2722 = vlog2.f32 %v1635_v10  ;;  %v1505_v6 = vmul.f32 1.442695, %v1415_v24  ;;  %v1413_v45 = vsub.f32 0.0, %v1349_v28 }
 0x1e0   : > { %v2705_v61 = vpop.eup %2704  ;;  %v1946_v11 = vmul.f32 %v2703_v44, %v3554_v12  ;;  %2724 = vlog2.f32 %v1601_v29  ;;  %v1445_v62 = vsub.f32 0.0, %v1381_v3  ;;  %v1384_v15 = vand.u32 2147483647, %v3770_v22 }
 0x1e1   : > { %v2707_v49 = vpop.eup %2706  ;;  %1978 = vst [vmem:[%s3459_s10 + $0x68] sm:$0xff] %v1914_v36  ;;  %v1919_v54 = vmul.f32 %v2705_v61, %v3567_v17  ;;  %2726 = vlog2.f32 %v1633_v52  ;;  %v1416_v12 = vsub.f32 0.0, %v1352_v2  ;;  %v1350_v58 = vand.u32 2147483647, %v3774_v37 }
 0x1e2   : > { %v2709_v31 = vpop.eup %2708  ;;  %2010 = vst [vmem:[%s3459_s10 + $0x168] sm:$0xff] %v1946_v11  ;;  %v1951_v40 = vmul.f32 %v2707_v49, %v3582_v60  ;;  %2728 = vlog2.f32 %v1604_v8  ;;  %v1569_v17 = vmul.f32 1.442695, %v1447_v55  ;;  %v1448_v19 = vsub.f32 0.0, %v1384_v15 }
 0x1e3   : > { %v2711_v24 = vpop.eup %2710  ;;  %1983 = vst [vmem:[%s3459_s10 + $0x90] sm:$0xff] %v1919_v54  ;;  %v1917_v33 = vmul.f32 %v2709_v31, %v3598_v0  ;;  %2730 = vpow2.f32 %v3729_v35  ;;  %v1501_v60 = vmul.f32 1.442695, %v1413_v45  ;;  %v1414_v20 = vsub.f32 0.0, %v1350_v58 }
 0x1e4   : > { %v2713_v9 = vpop.eup %2712  ;;  %2015 = vst [vmem:[%s3459_s10 + $0x190] sm:$0xff] %v1951_v40  ;;  %v1949_v10 = vmul.f32 %v2711_v24, %v3604_v21  ;;  %2732 = vpow2.f32 %v3736_v53  ;;  %v1565_v0 = vmul.f32 1.442695, %v1445_v62  ;;  %v1507_v3 = vmul.f32 1.442695, %v1416_v12  ;;  %v4029_v62 = vld [vmem:[#allocation23_spill] sm:$0xff] }
 0x1e5   : > { %v2715_v47 = vpop.eup %2714  ;;  %1981 = vst [vmem:[%s3459_s10 + $0x80] sm:$0xff] %v1917_v33  ;;  %v1920_v29 = vmul.f32 %v2713_v9, %v3611_v59  ;;  %2734 = vpow2.f32 %v1559_v38  ;;  %v1571_v53 = vmul.f32 1.442695, %v1448_v19  ;;  %v1503_v25 = vmul.f32 1.442695, %v1414_v20 }
 0x1e6   : > { %v2717_v28 = vpop.eup %2716  ;;  %2013 = vst [vmem:[%s3459_s10 + $0x180] sm:$0xff] %v1949_v10  ;;  %v1952_v35 = vmul.f32 %v2715_v47, %v3615_v7  ;;  %2736 = vpow2.f32 %v1505_v6  ;;  %v1283_v38 = vmax.f32 %v3670_v13, 0.0  ;;  %v1315_v44 = vmax.f32 %v3674_v5, 0.0 }
 0x1e7   : > { %v2719_v42 = vpop.eup %2718  ;;  %1984 = vst [vmem:[%s3459_s10 + $0x98] sm:$0xff] %v1920_v29  ;;  %v1918_v21 = vmul.f32 %v2717_v28, %v3623_v41  ;;  %2738 = vpow2.f32 %v1569_v17  ;;  %v1281_v41 = vmax.f32 %v3678_v30, 0.0  ;;  %v1313_v2 = vmax.f32 %v3682_v27, 0.0 }
 0x1e8   : > { %v2721_v52 = vpop.eup %2720  ;;  %2016 = vst [vmem:[%s3459_s10 + $0x198] sm:$0xff] %v1952_v35  ;;  %v1950_v59 = vmul.f32 %v2719_v42, %v3628_v18  ;;  %2740 = vpow2.f32 %v1501_v60  ;;  %v1284_v6 = vmax.f32 %v3689_v4, 0.0  ;;  %v3808_v15 = vadd.f32 %v3666_v34, %v4029_v62 }
 0x1e9   : > { %v2723_v8 = vpop.eup %2722  ;;  %1982 = vst [vmem:[%s3459_s10 + $0x88] sm:$0xff] %v1918_v21  ;;  %v1690_v7 = vmul.f32 0.6931472, %v2721_v52  ;;  %2742 = vpow2.f32 %v1565_v0  ;;  %v3812_v58 = vadd.f32 %v3666_v34, %v3489_v1  ;;  %v3816_v19 = vadd.f32 %v3666_v34, %v3491_v50 }
 0x1ea   : > { %v2725_v36 = vpop.eup %2724  ;;  %2014 = vst [vmem:[%s3459_s10 + $0x188] sm:$0xff] %v1950_v59  ;;  %v1754_v55 = vmul.f32 0.6931472, %v2723_v8  ;;  %2744 = vpow2.f32 %v1507_v3  ;;  %v3820_v20 = vadd.f32 %v3666_v34, %v3496_v43  ;;  %v1382_v29 = vand.u32 2147483647, %v3808_v15 }
 0x1eb   : > { %v2727_v61 = vpop.eup %2726  ;;  %v1795_v18 = vadd.f32 %v1690_v7, %v1283_v38  ;;  %v1686_v11 = vmul.f32 0.6931472, %v2725_v36  ;;  %2746 = vpow2.f32 %v1571_v53  ;;  %v3825_v0 = vadd.f32 %v3666_v34, %v3504_v48 }
 0x1ec   : > { %v2729_v45 = vpop.eup %2728  ;;  %v1827_v49 = vadd.f32 %v1754_v55, %v1315_v44  ;;  %v1750_v54 = vmul.f32 0.6931472, %v2727_v61  ;;  %2748 = vpow2.f32 %v1503_v25  ;;  %v1355_v35 = vand.u32 2147483647, %v3812_v58 }
 0x1ed   : > { %v2731_v31 = vpop.eup %2730  ;;  %2750 = vtanh.f32 %v1795_v18  ;;  %v1793_v40 = vadd.f32 %v1686_v11, %v1281_v41  ;;  %v1692_v12 = vmul.f32 0.6931472, %v2729_v45  ;;  %v1387_v43 = vand.u32 2147483647, %v3816_v19 }
 0x1ee   : > { %v2733_v24 = vpop.eup %2732  ;;  %2752 = vtanh.f32 %v1827_v49  ;;  %v1825_v33 = vadd.f32 %v1750_v54, %v1313_v2  ;;  %v1636_v17 = vadd.f32 1.0, %v2731_v31  ;;  %v1353_v52 = vand.u32 2147483647, %v3820_v20 }
 0x1ef   : > { %v2735_v9 = vpop.eup %2734  ;;  %2754 = vtanh.f32 %v1793_v40  ;;  %v1796_v10 = vadd.f32 %v1692_v12, %v1284_v6  ;;  %v1602_v60 = vadd.f32 1.0, %v2733_v24  ;;  %v1446_v48 = vsub.f32 0.0, %v1382_v29 }
 0x1f0   : > { %v2737_v47 = vpop.eup %2736  ;;  %2756 = vtanh.f32 %v1825_v33  ;;  %v1634_v1 = vadd.f32 1.0, %v2735_v9  ;;  %v1385_v8 = vand.u32 2147483647, %v3825_v0  ;;  %v1419_v44 = vsub.f32 0.0, %v1355_v35 }
 0x1f1   : > { %v2739_v28 = vpop.eup %2738  ;;  %2758 = vtanh.f32 %v1796_v10  ;;  %v1607_v50 = vadd.f32 1.0, %v2737_v47  ;;  %v1451_v41 = vsub.f32 0.0, %v1387_v43  ;;  %v1316_v61 = vmax.f32 %v3696_v32, 0.0 }
 0x1f2   : > { %v2741_v3 = vpop.eup %2740  ;;  %2760 = vlog2.f32 %v1636_v17  ;;  %v1639_v42 = vadd.f32 1.0, %v2739_v28  ;;  %v1417_v11 = vsub.f32 0.0, %v1353_v52  ;;  %v1567_v49 = vmul.f32 1.442695, %v1446_v48 }
 0x1f3   : > { %v2743_v21 = vpop.eup %2742  ;;  %2762 = vlog2.f32 %v1602_v60  ;;  %v1605_v53 = vadd.f32 1.0, %v2741_v3  ;;  %v1449_v54 = vsub.f32 0.0, %v1385_v8  ;;  %v1282_v40 = vmax.f32 %v3701_v56, 0.0 }
 0x1f4   : > { %v2745_v59 = vpop.eup %2744  ;;  %2764 = vlog2.f32 %v1634_v1  ;;  %v1637_v25 = vadd.f32 1.0, %v2743_v21  ;;  %v1513_v12 = vmul.f32 1.442695, %v1419_v44  ;;  %v1314_v17 = vmax.f32 %v3717_v39, 0.0 }
 0x1f5   : > { %v2747_v38 = vpop.eup %2746  ;;  %2766 = vlog2.f32 %v1607_v50  ;;  %v1608_v7 = vadd.f32 1.0, %v2745_v59  ;;  %v1509_v60 = vmul.f32 1.442695, %v1417_v11  ;;  %v1573_v29 = vmul.f32 1.442695, %v1449_v54 }
 0x1f6   : > { %v2749_v36 = vpop.eup %2748  ;;  %2768 = vlog2.f32 %v1639_v42  ;;  %v1640_v55 = vadd.f32 1.0, %v2747_v38  ;;  %v1285_v35 = vmax.f32 %v3753_v57, 0.0  ;;  %v1288_v43 = vmax.f32 %v3766_v46, 0.0  ;;  %v4030_v38 = vld [vmem:[#allocation24_spill] sm:$0xff] }
 0x1f7   : > { %v2751_v2 = vpop.eup %2750  ;;  %2770 = vlog2.f32 %v1605_v53  ;;  %v1606_v18 = vadd.f32 1.0, %v2749_v36  ;;  %v1320_v21 = vmax.f32 %v3770_v22, 0.0  ;;  %v1286_v59 = vmax.f32 %v3774_v37, 0.0 }
 0x1f8   : > { %v2753_v6 = vpop.eup %2752  ;;  %v1923_v45 = vmul.f32 %v2751_v2, %v3670_v13  ;;  %2772 = vlog2.f32 %v1637_v25  ;;  %v1577_v13 = vmul.f32 1.442695, %v1451_v41  ;;  %v3857_v41 = vadd.f32 %v3666_v34, %v3511_v16 }
 0x1f9   : > { %v2755_v62 = vpop.eup %2754  ;;  %v1955_v31 = vmul.f32 %v2753_v6, %v3674_v5  ;;  %2774 = vlog2.f32 %v1608_v7  ;;  %v1287_v5 = vmax.f32 %v3725_v63, 0.0  ;;  %v3853_v7 = vadd.f32 %v3666_v34, %v4030_v38 }
 0x1fa   : > { %v2757_v24 = vpop.eup %2756  ;;  %1987 = vst [vmem:[%s3459_s10 + $0xb0] sm:$0xff] %v1923_v45  ;;  %v1921_v33 = vmul.f32 %v2755_v62, %v3678_v30  ;;  %2776 = vlog2.f32 %v1640_v55  ;;  %v1319_v30 = vmax.f32 %v3745_v26, 0.0  ;;  %v3861_v11 = vadd.f32 %v3666_v34, %v3513_v23 }
 0x1fb   : > { %v2759_v9 = vpop.eup %2758  ;;  %2019 = vst [vmem:[%s3459_s10 + $0x1b0] sm:$0xff] %v1955_v31  ;;  %v1953_v10 = vmul.f32 %v2757_v24, %v3682_v27  ;;  %2778 = vlog2.f32 %v1606_v18  ;;  %v1317_v27 = vmax.f32 %v3759_v51, 0.0  ;;  %v3865_v54 = vadd.f32 %v3666_v34, %v3516_v14 }
 0x1fc   : > { %v2761_v47 = vpop.eup %2760  ;;  %1985 = vst [vmem:[%s3459_s10 + $0xa0] sm:$0xff] %v1921_v33  ;;  %v1924_v1 = vmul.f32 %v2759_v9, %v3689_v4  ;;  %2780 = vpow2.f32 %v1567_v49  ;;  %v1388_v23 = vand.u32 2147483647, %v3857_v41 }
 0x1fd   : > { %v2763_v28 = vpop.eup %2762  ;;  %2017 = vst [vmem:[%s3459_s10 + $0x1a0] sm:$0xff] %v1953_v10  ;;  %v1756_v50 = vmul.f32 0.6931472, %v2761_v47  ;;  %2782 = vpow2.f32 %v1513_v12  ;;  %v1354_v10 = vand.u32 2147483647, %v3861_v11 }
 0x1fe   : > { %v2765_v3 = vpop.eup %2764  ;;  %1988 = vst [vmem:[%s3459_s10 + $0xb8] sm:$0xff] %v1924_v1  ;;  %v1688_v42 = vmul.f32 0.6931472, %v2763_v28  ;;  %2784 = vpow2.f32 %v1577_v13 }
 0x1ff   : > { %v2767_v4 = vpop.eup %2766  ;;  %v1828_v53 = vadd.f32 %v1756_v50, %v1316_v61  ;;  %v1752_v52 = vmul.f32 0.6931472, %v2765_v3  ;;  %2786 = vpow2.f32 %v1509_v60  ;;  %v1386_v60 = vand.u32 2147483647, %v3865_v54 }
 0x200   : > { %v2769_v25 = vpop.eup %2768  ;;  %v1794_v48 = vadd.f32 %v1688_v42, %v1282_v40  ;;  %v1698_v8 = vmul.f32 0.6931472, %v2767_v4  ;;  %2788 = vpow2.f32 %v1573_v29  ;;  %v1356_v40 = vand.u32 2147483647, %v3853_v7 }
 0x201   : > { %v2771_v44 = vpop.eup %2770  ;;  %2790 = vtanh.f32 %v1828_v53  ;;  %v1826_v36 = vadd.f32 %v1752_v52, %v1314_v17  ;;  %v1762_v55 = vmul.f32 0.6931472, %v2769_v25  ;;  %v1418_v42 = vsub.f32 0.0, %v1354_v10 }
 0x202   : > { %v2773_v2 = vpop.eup %2772  ;;  %2792 = vtanh.f32 %v1794_v48  ;;  %v1799_v61 = vadd.f32 %v1698_v8, %v1287_v5  ;;  %v1694_v18 = vmul.f32 0.6931472, %v2771_v44  ;;  %v1420_v29 = vsub.f32 0.0, %v1356_v40 }
 0x203   : > { %v2775_v6 = vpop.eup %2774  ;;  %2794 = vtanh.f32 %v1826_v36  ;;  %v1831_v45 = vadd.f32 %v1762_v55, %v1319_v30  ;;  %v1758_v49 = vmul.f32 0.6931472, %v2773_v2  ;;  %v1450_v4 = vsub.f32 0.0, %v1386_v60 }
 0x204   : > { %v2777_v62 = vpop.eup %2776  ;;  %2796 = vtanh.f32 %v1799_v61  ;;  %v1797_v16 = vadd.f32 %v1694_v18, %v1285_v35  ;;  %v1700_v31 = vmul.f32 0.6931472, %v2775_v6  ;;  %v1452_v35 = vsub.f32 0.0, %v1388_v23 }
 0x205   : > { %v2779_v12 = vpop.eup %2778  ;;  %2798 = vtanh.f32 %v1831_v45  ;;  %v1829_v24 = vadd.f32 %v1758_v49, %v1317_v27  ;;  %v1764_v33 = vmul.f32 0.6931472, %v2777_v62  ;;  %v1511_v36 = vmul.f32 1.442695, %v1418_v42 }
 0x206   : > { %v2781_v17 = vpop.eup %2780  ;;  %2800 = vtanh.f32 %v1797_v16  ;;  %v1800_v13 = vadd.f32 %v1700_v31, %v1288_v43  ;;  %v1696_v9 = vmul.f32 0.6931472, %v2779_v12  ;;  %v1579_v8 = vmul.f32 1.442695, %v1452_v35 }
 0x207   : > { %v2783_v14 = vpop.eup %2782  ;;  %2802 = vtanh.f32 %v1829_v24  ;;  %v1832_v34 = vadd.f32 %v1764_v33, %v1320_v21  ;;  %v1638_v5 = vadd.f32 1.0, %v2781_v17  ;;  %v1575_v2 = vmul.f32 1.442695, %v1450_v4 }
 0x208   : > { %v2785_v47 = vpop.eup %2784  ;;  %2804 = vtanh.f32 %v1800_v13  ;;  %v1798_v1 = vadd.f32 %v1696_v9, %v1286_v59  ;;  %v1611_v30 = vadd.f32 1.0, %v2783_v14  ;;  %v1515_v59 = vmul.f32 1.442695, %v1420_v29 }
 0x209   : > { %v2787_v28 = vpop.eup %2786  ;;  %2806 = vtanh.f32 %v1832_v34  ;;  %v1643_v50 = vadd.f32 1.0, %v2785_v47  ;;  %v1318_v40 = vmax.f32 %v3808_v15, 0.0  ;;  %v1291_v24 = vmax.f32 %v3812_v58, 0.0 }
 0x20a   : > { %v2789_v27 = vpop.eup %2788  ;;  %2808 = vtanh.f32 %v1798_v1  ;;  %v1609_v3 = vadd.f32 1.0, %v2787_v28  ;;  %v1323_v17 = vmax.f32 %v3816_v19, 0.0  ;;  %v1289_v10 = vmax.f32 %v3820_v20, 0.0 }
 0x20b   : > { %v2791_v43 = vpop.eup %2790  ;;  %2810 = vlog2.f32 %v1638_v5  ;;  %v1641_v21 = vadd.f32 1.0, %v2789_v27  ;;  %v1321_v5 = vmax.f32 %v3825_v0, 0.0 }
 0x20c   : > { %v2793_v53 = vpop.eup %2792  ;;  %v1956_v52 = vmul.f32 %v2791_v43, %v3696_v32  ;;  %2812 = vlog2.f32 %v1611_v30 }
 0x20d   : > { %v2795_v25 = vpop.eup %2794  ;;  %v1922_v48 = vmul.f32 %v2793_v53, %v3701_v56  ;;  %2814 = vlog2.f32 %v1643_v50 }
 0x20e   : > { %v2797_v38 = vpop.eup %2796  ;;  %2020 = vst [vmem:[%s3459_s10 + $0x1b8] sm:$0xff] %v1956_v52  ;;  %v1954_v44 = vmul.f32 %v2795_v25, %v3717_v39  ;;  %2816 = vlog2.f32 %v1609_v3 }
 0x20f   : > { %v2799_v55 = vpop.eup %2798  ;;  %1986 = vst [vmem:[%s3459_s10 + $0xa8] sm:$0xff] %v1922_v48  ;;  %v1927_v32 = vmul.f32 %v2797_v38, %v3725_v63  ;;  %2818 = vlog2.f32 %v1641_v21 }
 0x210   : > { %v2801_v61 = vpop.eup %2800  ;;  %2018 = vst [vmem:[%s3459_s10 + $0x1a8] sm:$0xff] %v1954_v44  ;;  %v1959_v56 = vmul.f32 %v2799_v55, %v3745_v26  ;;  %2820 = vpow2.f32 %v1515_v59 }
 0x211   : > { %v2803_v18 = vpop.eup %2802  ;;  %1991 = vst [vmem:[%s3459_s10 + $0xd0] sm:$0xff] %v1927_v32  ;;  %v1925_v39 = vmul.f32 %v2801_v61, %v3753_v57  ;;  %2822 = vpow2.f32 %v1579_v8 }
 0x212   : > { %v2805_v6 = vpop.eup %2804  ;;  %2023 = vst [vmem:[%s3459_s10 + $0x1d0] sm:$0xff] %v1959_v56  ;;  %v1957_v63 = vmul.f32 %v2803_v18, %v3759_v51  ;;  %2824 = vpow2.f32 %v1511_v36 }
 0x213   : > { %v2807_v45 = vpop.eup %2806  ;;  %1989 = vst [vmem:[%s3459_s10 + $0xc0] sm:$0xff] %v1925_v39  ;;  %v1928_v49 = vmul.f32 %v2805_v6, %v3766_v46  ;;  %2826 = vpow2.f32 %v1575_v2 }
 0x214   : > { %v2809_v26 = vpop.eup %2808  ;;  %2021 = vst [vmem:[%s3459_s10 + $0x1c0] sm:$0xff] %v1957_v63  ;;  %v1960_v62 = vmul.f32 %v2807_v45, %v3770_v22 }
 0x215   : > { %v2811_v16 = vpop.eup %2810  ;;  %1992 = vst [vmem:[%s3459_s10 + $0xd8] sm:$0xff] %v1928_v49  ;;  %v1926_v57 = vmul.f32 %v2809_v26, %v3774_v37 }
 0x216   : > { %v2813_v31 = vpop.eup %2812  ;;  %2024 = vst [vmem:[%s3459_s10 + $0x1d8] sm:$0xff] %v1960_v62  ;;  %v1760_v51 = vmul.f32 0.6931472, %v2811_v16 }
 0x217   : > { %v2815_v12 = vpop.eup %2814  ;;  %1990 = vst [vmem:[%s3459_s10 + $0xc8] sm:$0xff] %v1926_v57  ;;  %v1706_v33 = vmul.f32 0.6931472, %v2813_v31 }
 0x218   : > { %v2817_v46 = vpop.eup %2816  ;;  %v1830_v23 = vadd.f32 %v1760_v51, %v1318_v40  ;;  %v1770_v13 = vmul.f32 0.6931472, %v2815_v12 }
 0x219   : > { %v2819_v22 = vpop.eup %2818  ;;  %v1803_v9 = vadd.f32 %v1706_v33, %v1291_v24  ;;  %v1702_v37 = vmul.f32 0.6931472, %v2817_v46 }
 0x21a   : > { %v2821_v14 = vpop.eup %2820  ;;  %2828 = vtanh.f32 %v1830_v23  ;;  %v1835_v34 = vadd.f32 %v1770_v13, %v1323_v17  ;;  %v1766_v60 = vmul.f32 0.6931472, %v2819_v22 }
 0x21b   : > { %v2823_v47 = vpop.eup %2822  ;;  %2830 = vtanh.f32 %v1803_v9  ;;  %v1801_v1 = vadd.f32 %v1702_v37, %v1289_v10  ;;  %v1612_v30 = vadd.f32 1.0, %v2821_v14 }
 0x21c   : > { %v2825_v29 = vpop.eup %2824  ;;  %2832 = vtanh.f32 %v1835_v34  ;;  %v1833_v28 = vadd.f32 %v1766_v60, %v1321_v5  ;;  %v1644_v50 = vadd.f32 1.0, %v2823_v47 }
 0x21d   : > { %v2827_v35 = vpop.eup %2826  ;;  %2834 = vtanh.f32 %v1801_v1  ;;  %v1610_v27 = vadd.f32 1.0, %v2825_v29 }
 0x21e   : > { %2836 = vtanh.f32 %v1833_v28  ;;  %v1642_v3 = vadd.f32 1.0, %v2827_v35 }
 0x21f   : > { %2838 = vlog2.f32 %v1612_v30 }
 0x220   : > { %2840 = vlog2.f32 %v1644_v50 }
 0x221   : > { %2842 = vlog2.f32 %v1610_v27 }
 0x222   : > { %2844 = vlog2.f32 %v1642_v3 }
 0x224   : > { %v2829_v42 = vpop.eup %2828 }
 0x225   : > { %v2831_v43 = vpop.eup %2830  ;;  %v1958_v21 = vmul.f32 %v2829_v42, %v3808_v15  ;;  %v1292_v15 = vmax.f32 %v3853_v7, 0.0 }
 0x226   : > { %v2833_v4 = vpop.eup %2832  ;;  %v1931_v53 = vmul.f32 %v2831_v43, %v3812_v58  ;;  %v1324_v58 = vmax.f32 %v3857_v41, 0.0 }
 0x227   : > { %v2835_v52 = vpop.eup %2834  ;;  %2022 = vst [vmem:[%s3459_s10 + $0x1c8] sm:$0xff] %v1958_v21  ;;  %v1963_v59 = vmul.f32 %v2833_v4, %v3816_v19 }
 0x228   : > { %v2837_v25 = vpop.eup %2836  ;;  %1995 = vst [vmem:[%s3459_s10 + $0xf0] sm:$0xff] %v1931_v53  ;;  %v1929_v48 = vmul.f32 %v2835_v52, %v3820_v20  ;;  %v1290_v20 = vmax.f32 %v3861_v11, 0.0 }
 0x229   : > { %v2839_v8 = vpop.eup %2838  ;;  %2027 = vst [vmem:[%s3459_s10 + $0x1f0] sm:$0xff] %v1963_v59  ;;  %v1961_v38 = vmul.f32 %v2837_v25, %v3825_v0  ;;  %v1322_v0 = vmax.f32 %v3865_v54, 0.0 }
 0x22a   : > { %v2841_v44 = vpop.eup %2840  ;;  %1993 = vst [vmem:[%s3459_s10 + $0xe0] sm:$0xff] %v1929_v48  ;;  %v1708_v36 = vmul.f32 0.6931472, %v2839_v8 }
 0x22b   : > { %v2843_v55 = vpop.eup %2842  ;;  %2025 = vst [vmem:[%s3459_s10 + $0x1e0] sm:$0xff] %v1961_v38  ;;  %v1772_v32 = vmul.f32 0.6931472, %v2841_v44 }
 0x22c   : > { %v2845_v19 = vpop.eup %2844  ;;  %v1804_v2 = vadd.f32 %v1708_v36, %v1292_v15  ;;  %v1704_v61 = vmul.f32 0.6931472, %v2843_v55 }
 0x22d   : > { %v1836_v56 = vadd.f32 %v1772_v32, %v1324_v58  ;;  %v1768_v18 = vmul.f32 0.6931472, %v2845_v19 }
 0x22e   : > { %2846 = vtanh.f32 %v1804_v2  ;;  %v1802_v39 = vadd.f32 %v1704_v61, %v1290_v20 }
 0x22f   : > { %2848 = vtanh.f32 %v1836_v56  ;;  %v1834_v6 = vadd.f32 %v1768_v18, %v1322_v0 }
 0x230   : > { %2850 = vtanh.f32 %v1802_v39 }
 0x231   : > { %2852 = vtanh.f32 %v1834_v6 }
 0x238   : > { %v2847_v63 = vpop.eup %2846 }
 0x239   : > { %v2849_v45 = vpop.eup %2848  ;;  %v1932_v49 = vmul.f32 %v2847_v63, %v3853_v7 }
 0x23a   : > { %v2851_v26 = vpop.eup %2850  ;;  %v1964_v62 = vmul.f32 %v2849_v45, %v3857_v41 }
 0x23b   : > { %v2853_v16 = vpop.eup %2852  ;;  %1996 = vst [vmem:[%s3459_s10 + $0xf8] sm:$0xff] %v1932_v49  ;;  %v1930_v57 = vmul.f32 %v2851_v26, %v3861_v11 }
 0x23c   : > { %2028 = vst [vmem:[%s3459_s10 + $0x1f8] sm:$0xff] %v1964_v62  ;;  %v1962_v31 = vmul.f32 %v2853_v16, %v3865_v54 }
 0x23d   : > { %1994 = vst [vmem:[%s3459_s10 + $0xe8] sm:$0xff] %v1930_v57 }
 0x23e   : > { %2026 = vst [vmem:[%s3459_s10 + $0x1e8] sm:$0xff] %v1962_v31 }
 0x23f   : > { %2926 = shalt.err (!%p2923_p5)
}
 0x240   : > { %s2927_s8 = scalar_lea.hbm %s3919_s21, 8192  ;;  %s2931_s24 = scalar_lea.hbm %s3977_s3, 16384 }
 0x241   : > { %p2928_p9 = scmp.ne.s32.totalorder %s3919_s21, %s2927_s8  ;;  %p2932_p3 = scmp.lt.u32.totalorder %s3919_s21, %s3977_s3 }
 0x242   : > { %p2933_p7 = scmp.lt.u32.totalorder %s2931_s24, %s2927_s8  ;;  %p2935_p4 = scmp.lt.u32.totalorder %s2927_s8, %s3919_s21 }
 0x243   : > { %p2929_p1 = pnand %p2928_p9, %p3127_p10 }
 0x244   : > { %p2934_p13 = por %p2933_p7, %p2932_p3 }
 0x245   : > { %p2930_p2 = pneg %p2929_p1 }
 0x246   : > { %p2936_p6 = por %p2935_p4, %p2934_p13 }
 0x248   : > { %p2937_p8 = pnand %p2936_p6, %p2930_p2 }
 0x24a   : > { %2940 = shalt.err (!%p2937_p8)
}
 0x24b   : > { %s3006_s9 = smov 128   ;;  %s3007_s18 = smov 8  }
 0x24c   : > { %2359 = dma.vmem_to_hbm [thread:$0]  (%p3127_p10), %s3923_s19, 8192, %s3919_s21, %s2030_s15, %s3006_s9, %s3006_s9, %s3007_s18  }
 0x24d PF: > { %s2059_s25 = sand.u32 1, %s2979_s12   ;;  %p4031_p12 = scmp.ne.s32.totalorder %s3985_s23, 0 }
 0x24e   : > { %p4032_p11 = scmp.ge.s32.totalorder %s2999_s17, 2  ;;  %s2060_s26 = scalar_lea.sflag [#allocation5], %s2059_s25 }
 0x250   : > { %p2370_p0 = pnand %p4032_p11, %p4031_p12 }
 0x252   : > { %2974 = dma.done.wait (!%p2370_p0), %s2060_s26, 8192  }
 0x253   : > { %2976 = vsyncadd (!%p2370_p0), %s2060_s26, 4294959104  ;;  %s20_s17 = sadd.s32 1, %s2999_s17   ;;  %s4033_s12 = smov %s2983_s13 }
 0x254   : > { %p17_p5 = scmp.ge.s32.totalorder %s20_s17, 4   ;;  %s4034_s13 = smov %s2987_s14 }
 0x255   : > { %s4035_s14 = smov %s3136_s5  ;;  %s4036_s15 = smov %s2995_s16 }
 0x256   : > { %s4037_s16 = smov %s4039_s28  ;;  %19 = sbr.rel (!%p17_p5) target bundleno = 7 (0x7), region = 93 }
 0x25d   :  { %2065 = vsyncpa [#allocation4], 1 }
 0x25e   :  { %2067 = vsyncpa [#allocation4 + $0x1], 1 }
 0x25f   :  { %2068 = vsyncpa [#allocation7], 1 }
 0x260   :  { %2069 = vsyncpa [#allocation5], 1 }
 0x261   :  { %2071 = vsyncpa [#allocation5 + $0x1], 1 }

</bundles_post_ra>
